<compile_context>
chip_gen: v7x
topology: tpu7x:2x2x1
jax: 0.10.0
libtpu: 0.0.40
codegen_flags: <defaults>
</compile_context>

<pallas_src>
import functools

import jax
import jax.numpy as jnp
from jax.experimental import pallas as pl
from jax.experimental.pallas import tpu as pltpu


# -----------------------------------------------------------------------------
# Pallas kernel: full bottleneck block for one image (grid iterates over batch)
# -----------------------------------------------------------------------------
def bottleneck_kernel(x_ref, mask_ref, w1_ref, w2_ref, w3_ref,
                      b1_ref, b2_ref, b3_ref, out_ref, h1_scr, *, W):
    Wp = W + 2
    PADLEN = out_ref.shape[2]     # (H+2) * (W+2): shared padded frame length
    S = Wp + 1                    # h1 scratch shift so every tap offset is >= 0

    # One-time: zero the scratch so the lanes outside the per-step h1 window
    # (only ever read by taps of pad-frame output positions, which are masked)
    # hold finite values.  Edges are never rewritten, so once is enough.
    @pl.when(pl.program_id(0) == 0)
    def _init():
        h1_scr[...] = jnp.zeros_like(h1_scr)

    x = x_ref[0]                                              # (Cin, PADLEN) bf16

    # ---- conv1 (1x1, BN folded) + bias + relu, pad ring zeroed ---------------
    c1 = jnp.dot(w1_ref[...], x, preferred_element_type=jnp.float32)
    h1 = jnp.maximum(c1 + b1_ref[...], 0.0).astype(jnp.bfloat16) * mask_ref[...]
    h1_scr[:, pl.ds(S, PADLEN)] = h1                          # shifted store

    # ---- conv2 (3x3, stride 1, pad 1) + bias + relu: 9 per-tap matmuls -------
    # Tap (kh, kw) of the zero-ringed h1 is the flat scratch slice starting at
    # kh*Wp + kw (thanks to the +S shift).  f32 accumulation; no im2col concat.
    # TODO(synk): on v5e (4x128 MXU) a fused K=9P matmul may be preferable; if
    # so, build it via 3 pltpu.roll'ed copies of h1 rather than slices+concat.
    c2 = None
    for kh in range(3):
        for kw in range(3):
            tap = h1_scr[:, pl.ds(kh * Wp + kw, PADLEN)]      # (P, PADLEN) bf16
            d = jnp.dot(w2_ref[kh * 3 + kw], tap,
                        preferred_element_type=jnp.float32)   # (P, PADLEN) f32
            c2 = d if c2 is None else c2 + d
    h2 = jnp.maximum(c2 + b2_ref[...], 0.0).astype(jnp.bfloat16)

    # ---- conv3 (1x1, BN folded) + bias + residual + relu + ring mask ---------
    c3 = jnp.dot(w3_ref[...], h2, preferred_element_type=jnp.float32)
    out = jnp.maximum(c3 + b3_ref[...] + x, 0.0)              # residual add in f32
    out_ref[0] = out.astype(out_ref.dtype) * mask_ref[...]


# -----------------------------------------------------------------------------
# Layout helpers (network-boundary cost only; chained blocks stay in the
# padded flat bf16 layout and never pay these extra HBM passes)
# -----------------------------------------------------------------------------
def pad_nchw_to_flat(x_nchw):
    """NCHW -> bf16 padded flat layout (N, C, (H+2)*(W+2)) with a zero ring."""
    N, C, H, W = x_nchw.shape
    xp = jnp.pad(x_nchw, ((0, 0), (0, 0), (1, 1), (1, 1)))
    return xp.reshape(N, C, (H + 2) * (W + 2)).astype(jnp.bfloat16)


def flat_to_nchw(x_flat, H, W):
    """Padded flat layout -> NCHW (drops the zero ring)."""
    N, C, _ = x_flat.shape
    return x_flat.reshape(N, C, H + 2, W + 2)[:, :, 1:H + 1, 1:W + 1]


# -----------------------------------------------------------------------------
# Core call: consumes and produces the persistent padded flat bf16 layout
# -----------------------------------------------------------------------------
def bottleneck_padded(x_flat, w1t, w2taps, w3t, b1, b2, b3, *, H, W):
    """x_flat: (N, Cin, (H+2)*(W+2)) bf16, zero pad ring.
    Returns (N, C4, (H+2)*(W+2)) bf16 in the same frame (zero pad ring)."""
    N, Cin, PADLEN = x_flat.shape
    Wp = W + 2
    assert PADLEN == (H + 2) * Wp
    P = w1t.shape[0]
    C4 = w3t.shape[0]

    # 0/1 mask of the valid (non-padding) positions in the padded flat frame.
    rows = jnp.arange(H + 2)
    cols = jnp.arange(Wp)
    valid = (((rows >= 1) & (rows <= H))[:, None]
             & ((cols >= 1) & (cols <= W))[None, :])
    mask = valid.astype(jnp.bfloat16).reshape(1, PADLEN)

    # h1 scratch: padded frame shifted by Wp+1 plus tap-overrun room.
    LS = ((PADLEN + 2 * Wp + 2 + 127) // 128) * 128

    def full_spec(arr):
        nd = arr.ndim
        return pl.BlockSpec(arr.shape, lambda n, _nd=nd: (0,) * _nd)

    return pl.pallas_call(
        functools.partial(bottleneck_kernel, W=W),
        out_shape=jax.ShapeDtypeStruct((N, C4, PADLEN), jnp.bfloat16),
        grid_spec=pltpu.PrefetchScalarGridSpec(
            num_scalar_prefetch=0,
            grid=(N,),
            in_specs=[
                # TODO(synk): if a v6e trace shows exposed input DMA at step
                # boundaries, add pipeline_mode=pl.Buffered(3) on this spec.
                pl.BlockSpec((1, Cin, PADLEN), lambda n: (n, 0, 0)),
                full_spec(mask),
                full_spec(w1t), full_spec(w2taps), full_spec(w3t),
                full_spec(b1), full_spec(b2), full_spec(b3),
            ],
            out_specs=pl.BlockSpec((1, C4, PADLEN), lambda n: (n, 0, 0)),
            scratch_shapes=[pltpu.VMEM((P, LS), jnp.bfloat16)],
        ),
        compiler_params=pltpu.CompilerParams(
            dimension_semantics=("parallel",),
            # Explicit scoped-VMEM limit (v5e default is 16 MiB; production
            # 56x58 / 256-channel blocks need more even with bf16 activations).
            vmem_limit_bytes=64 * 1024 * 1024),
    )(x_flat, mask, w1t, w2taps, w3t, b1, b2, b3)


def bottleneck_forward(x_nchw, w1t, w2taps, w3t, b1, b2, b3):
    """NCHW convenience wrapper for a single block (demo / reference check)."""
    N, Cin, H, W = x_nchw.shape
    x_flat = pad_nchw_to_flat(x_nchw)
    out_flat = bottleneck_padded(x_flat, w1t, w2taps, w3t, b1, b2, b3, H=H, W=W)
    return flat_to_nchw(out_flat, H, W).astype(x_nchw.dtype)


# -----------------------------------------------------------------------------
# Pure-JAX reference (NCHW, lax.conv) for correctness check
# -----------------------------------------------------------------------------
def bottleneck_ref(x, w1_oihw, w2_oihw, w3_oihw, bn1, bn2, bn3, eps=1e-5):
    def conv(x, w, pad):
        return jax.lax.conv_general_dilated(
            x, w, (1, 1), [(pad, pad), (pad, pad)],
            dimension_numbers=('NCHW', 'OIHW', 'NCHW'))

    def bn(x, p):
        g, b, m, v = p
        g, b, m, v = (a[None, :, None, None] for a in (g, b, m, v))
        return (x - m) / jnp.sqrt(v + eps) * g + b

    out = jax.nn.relu(bn(conv(x, w1_oihw, 0), bn1))
    out = jax.nn.relu(bn(conv(out, w2_oihw, 1), bn2))
    out = bn(conv(out, w3_oihw, 0), bn3)
    return jax.nn.relu(out + x)


if __name__ == "__main__":
    # Small shapes consistent with the module: inplanes = planes * expansion
    N, H, W = 2, 16, 16
    planes = 8
    inplanes = planes * 4                     # 32, identity residual path
    eps = 1e-5

    key = jax.random.PRNGKey(0)
    ks = jax.random.split(key, 16)

    # PyTorch-layout conv weights (OIHW), deterministic init
    w1_oihw = jax.random.normal(ks[0], (planes, inplanes, 1, 1), jnp.float32) * 0.1
    w2_oihw = jax.random.normal(ks[1], (planes, planes, 3, 3), jnp.float32) * 0.1
    w3_oihw = jax.random.normal(ks[2], (planes * 4, planes, 1, 1), jnp.float32) * 0.1

    def bn_params(k, c):
        k1, k2, k3, k4 = jax.random.split(k, 4)
        gamma = jax.random.uniform(k1, (c,), jnp.float32, 0.5, 1.5)
        beta = jax.random.normal(k2, (c,), jnp.float32) * 0.1
        mean = jax.random.normal(k3, (c,), jnp.float32) * 0.1
        var = jax.random.uniform(k4, (c,), jnp.float32, 0.5, 1.5)
        return gamma, beta, mean, var

    bn1 = bn_params(ks[3], planes)
    bn2 = bn_params(ks[4], planes)
    bn3 = bn_params(ks[5], planes * 4)

    # Fold BN (inference) into per-output-channel scale on the conv weights
    # plus a bias vector (kernel epilogues are just bias + relu).
    def fold_bn(p):
        g, b, m, v = p
        s = g / jnp.sqrt(v + eps)
        return s, b - m * s

    s1, bb1 = fold_bn(bn1)
    s2, bb2 = fold_bn(bn2)
    s3, bb3 = fold_bn(bn3)

    # Kernel-layout, BN-folded, bf16 weights.
    w1t = (w1_oihw[:, :, 0, 0] * s1[:, None]).astype(jnp.bfloat16)      # (P, Cin)
    w2taps = (jnp.transpose(w2_oihw, (2, 3, 0, 1)).reshape(9, planes, planes)
              * s2[None, :, None]).astype(jnp.bfloat16)                 # (9, P, P)
    w3t = (w3_oihw[:, :, 0, 0] * s3[:, None]).astype(jnp.bfloat16)      # (C4, P)
    b1 = bb1[:, None].astype(jnp.float32)                               # (P, 1)
    b2 = bb2[:, None].astype(jnp.float32)                               # (P, 1)
    b3 = bb3[:, None].astype(jnp.float32)                               # (C4, 1)

    x = jax.random.normal(ks[10], (N, inplanes, H, W), jnp.float32)

    out = bottleneck_forward(x, w1t, w2taps, w3t, b1, b2, b3)
    out = jax.block_until_ready(out)

    ref = bottleneck_ref(x, w1_oihw, w2_oihw, w3_oihw, bn1, bn2, bn3, eps)
    assert out.shape == (N, planes * 4, H, W)
    # bf16 activations end-to-end + bf16 MXU operands (f32 accumulation)
    # -> relaxed tolerance vs the f32 reference.
    assert jnp.allclose(out, ref, atol=3e-2, rtol=3e-2), "mismatch vs reference"

    print("KERNEL_OK")
</pallas_src>

<mosaic_0001>
module attributes {stable_mosaic.version = 11 : i64} {
  func.func @bottleneck_kernel(%arg0: i32, %arg1: memref<1x32x324xbf16, #tpu.memory_space<vmem>>, %arg2: memref<1x324xbf16, #tpu.memory_space<vmem>>, %arg3: memref<8x32xbf16, #tpu.memory_space<vmem>>, %arg4: memref<9x8x8xbf16, #tpu.memory_space<vmem>>, %arg5: memref<32x8xbf16, #tpu.memory_space<vmem>>, %arg6: memref<8x1xf32, #tpu.memory_space<vmem>>, %arg7: memref<8x1xf32, #tpu.memory_space<vmem>>, %arg8: memref<32x1xf32, #tpu.memory_space<vmem>>, %arg9: memref<1x32x324xbf16, #tpu.memory_space<vmem>>, %arg10: memref<8x384xbf16, #tpu.memory_space<vmem>>) attributes {dimension_semantics = [#tpu.dimension_semantics<parallel>], iteration_bounds = array<i64: 2>, scalar_prefetch = 0 : i64, scratch_operands = 1 : i64, tpu.core_type = #tpu.core_type<tc>, window_params = [{transform_indices = @transform_0, window_bounds = array<i64: 1, 32, 324>}, {pipeline_mode = #tpu.pipeline_mode<synchronous>, transform_indices = @transform_1, window_bounds = array<i64: 1, 324>}, {pipeline_mode = #tpu.pipeline_mode<synchronous>, transform_indices = @transform_2, window_bounds = array<i64: 8, 32>}, {pipeline_mode = #tpu.pipeline_mode<synchronous>, transform_indices = @transform_3, window_bounds = array<i64: 9, 8, 8>}, {pipeline_mode = #tpu.pipeline_mode<synchronous>, transform_indices = @transform_4, window_bounds = array<i64: 32, 8>}, {pipeline_mode = #tpu.pipeline_mode<synchronous>, transform_indices = @transform_5, window_bounds = array<i64: 8, 1>}, {pipeline_mode = #tpu.pipeline_mode<synchronous>, transform_indices = @transform_6, window_bounds = array<i64: 8, 1>}, {pipeline_mode = #tpu.pipeline_mode<synchronous>, transform_indices = @transform_7, window_bounds = array<i64: 32, 1>}, {transform_indices = @transform_8, window_bounds = array<i64: 1, 32, 324>}]} {
    %c0_i32 = arith.constant 0 : i32
    %0 = arith.cmpi eq, %arg0, %c0_i32 : i32
    %1 = arith.extui %0 : i1 to i32
    %c0_i32_0 = arith.constant 0 : i32
    %2 = arith.cmpi ne, %1, %c0_i32_0 : i32
    scf.if %2 {
      %cst_66 = arith.constant 0.000000e+00 : bf16
      %83 = vector.broadcast %cst_66 : bf16 to vector<8x384xbf16>
      %c0_67 = arith.constant 0 : index
      %c0_68 = arith.constant 0 : index
      %84 = vector.load %arg10[%c0_67, %c0_68] : memref<8x384xbf16, #tpu.memory_space<vmem>>, vector<8x384xbf16>
      tpu.vector_store %arg10[%c0_67, %c0_68], %83 {strides = array<i32>} : memref<8x384xbf16, #tpu.memory_space<vmem>>, vector<8x384xbf16>,
    } else {
    }
    %c0 = arith.constant 0 : index
    %c0_1 = arith.constant 0 : index
    %c0_2 = arith.constant 0 : index
    %3 = vector.load %arg1[%c0, %c0_1, %c0_2] : memref<1x32x324xbf16, #tpu.memory_space<vmem>>, vector<1x32x324xbf16>
    %4 = vector.shape_cast %3 : vector<1x32x324xbf16> to vector<32x324xbf16>
    %c0_3 = arith.constant 0 : index
    %c0_4 = arith.constant 0 : index
    %5 = vector.load %arg3[%c0_3, %c0_4] : memref<8x32xbf16, #tpu.memory_space<vmem>>, vector<8x32xbf16>
    %cst = arith.constant dense<0.000000e+00> : vector<8x324xf32>
    %6 = tpu.matmul %5, %4, %cst {dimension_numbers = #tpu.dot_dimension_numbers<[1], [0], [0], [1], [0, 0, 1, 1], [], []>} : vector<8x32xbf16>, vector<32x324xbf16>, vector<8x324xf32> -> vector<8x324xf32>
    %c0_5 = arith.constant 0 : index
    %c0_6 = arith.constant 0 : index
    %7 = vector.load %arg6[%c0_5, %c0_6] : memref<8x1xf32, #tpu.memory_space<vmem>>, vector<8x1xf32>
    %8 = vector.broadcast %7 : vector<8x1xf32> to vector<8x324xf32>
    %9 = arith.addf %6, %8 : vector<8x324xf32>
    %cst_7 = arith.constant 0.000000e+00 : f32
    %10 = vector.broadcast %cst_7 : f32 to vector<8x324xf32>
    %11 = arith.maximumf %9, %10 : vector<8x324xf32>
    %12 = arith.truncf %11 : vector<8x324xf32> to vector<8x324xbf16>
    %c0_8 = arith.constant 0 : index
    %c0_9 = arith.constant 0 : index
    %13 = vector.load %arg2[%c0_8, %c0_9] : memref<1x324xbf16, #tpu.memory_space<vmem>>, vector<1x324xbf16>
    %14 = vector.broadcast %13 : vector<1x324xbf16> to vector<8x324xbf16>
    %15 = arith.mulf %12, %14 : vector<8x324xbf16>
    %c0_10 = arith.constant 0 : index
    %c19 = arith.constant 19 : index
    %16 = vector.load %arg10[%c0_10, %c19] : memref<8x384xbf16, #tpu.memory_space<vmem>>, vector<8x324xbf16>
    tpu.vector_store %arg10[%c0_10, %c19], %15 {strides = array<i32>} : memref<8x384xbf16, #tpu.memory_space<vmem>>, vector<8x324xbf16>,
    %c0_11 = arith.constant 0 : index
    %c0_12 = arith.constant 0 : index
    %17 = vector.load %arg10[%c0_11, %c0_12] : memref<8x384xbf16, #tpu.memory_space<vmem>>, vector<8x324xbf16>
    %c0_13 = arith.constant 0 : index
    %c0_14 = arith.constant 0 : index
    %c0_15 = arith.constant 0 : index
    %18 = vector.load %arg4[%c0_13, %c0_14, %c0_15] : memref<9x8x8xbf16, #tpu.memory_space<vmem>>, vector<1x8x8xbf16>
    %19 = vector.shape_cast %18 : vector<1x8x8xbf16> to vector<8x8xbf16>
    %cst_16 = arith.constant dense<0.000000e+00> : vector<8x324xf32>
    %20 = tpu.matmul %19, %17, %cst_16 {dimension_numbers = #tpu.dot_dimension_numbers<[1], [0], [0], [1], [0, 0, 1, 1], [], []>} : vector<8x8xbf16>, vector<8x324xbf16>, vector<8x324xf32> -> vector<8x324xf32>
    %c0_17 = arith.constant 0 : index
    %c1 = arith.constant 1 : index
    %21 = vector.load %arg10[%c0_17, %c1] : memref<8x384xbf16, #tpu.memory_space<vmem>>, vector<8x324xbf16>
    %c1_18 = arith.constant 1 : index
    %c0_19 = arith.constant 0 : index
    %c0_20 = arith.constant 0 : index
    %22 = vector.load %arg4[%c1_18, %c0_19, %c0_20] : memref<9x8x8xbf16, #tpu.memory_space<vmem>>, vector<1x8x8xbf16>
    %23 = vector.shape_cast %22 : vector<1x8x8xbf16> to vector<8x8xbf16>
    %cst_21 = arith.constant dense<0.000000e+00> : vector<8x324xf32>
    %24 = tpu.matmul %23, %21, %cst_21 {dimension_numbers = #tpu.dot_dimension_numbers<[1], [0], [0], [1], [0, 0, 1, 1], [], []>} : vector<8x8xbf16>, vector<8x324xbf16>, vector<8x324xf32> -> vector<8x324xf32>
    %25 = arith.addf %20, %24 : vector<8x324xf32>
    %c0_22 = arith.constant 0 : index
    %c2 = arith.constant 2 : index
    %26 = vector.load %arg10[%c0_22, %c2] : memref<8x384xbf16, #tpu.memory_space<vmem>>, vector<8x324xbf16>
    %c2_23 = arith.constant 2 : index
    %c0_24 = arith.constant 0 : index
    %c0_25 = arith.constant 0 : index
    %27 = vector.load %arg4[%c2_23, %c0_24, %c0_25] : memref<9x8x8xbf16, #tpu.memory_space<vmem>>, vector<1x8x8xbf16>
    %28 = vector.shape_cast %27 : vector<1x8x8xbf16> to vector<8x8xbf16>
    %cst_26 = arith.constant dense<0.000000e+00> : vector<8x324xf32>
    %29 = tpu.matmul %28, %26, %cst_26 {dimension_numbers = #tpu.dot_dimension_numbers<[1], [0], [0], [1], [0, 0, 1, 1], [], []>} : vector<8x8xbf16>, vector<8x324xbf16>, vector<8x324xf32> -> vector<8x324xf32>
    %30 = arith.addf %25, %29 : vector<8x324xf32>
    %c0_27 = arith.constant 0 : index
    %c18 = arith.constant 18 : index
    %31 = vector.load %arg10[%c0_27, %c18] : memref<8x384xbf16, #tpu.memory_space<vmem>>, vector<8x324xbf16>
    %c3 = arith.constant 3 : index
    %c0_28 = arith.constant 0 : index
    %c0_29 = arith.constant 0 : index
    %32 = vector.load %arg4[%c3, %c0_28, %c0_29] : memref<9x8x8xbf16, #tpu.memory_space<vmem>>, vector<1x8x8xbf16>
    %33 = vector.shape_cast %32 : vector<1x8x8xbf16> to vector<8x8xbf16>
    %cst_30 = arith.constant dense<0.000000e+00> : vector<8x324xf32>
    %34 = tpu.matmul %33, %31, %cst_30 {dimension_numbers = #tpu.dot_dimension_numbers<[1], [0], [0], [1], [0, 0, 1, 1], [], []>} : vector<8x8xbf16>, vector<8x324xbf16>, vector<8x324xf32> -> vector<8x324xf32>
    %35 = arith.addf %30, %34 : vector<8x324xf32>
    %c0_31 = arith.constant 0 : index
    %c19_32 = arith.constant 19 : index
    %36 = vector.load %arg10[%c0_31, %c19_32] : memref<8x384xbf16, #tpu.memory_space<vmem>>, vector<8x324xbf16>
    %c4 = arith.constant 4 : index
    %c0_33 = arith.constant 0 : index
    %c0_34 = arith.constant 0 : index
    %37 = vector.load %arg4[%c4, %c0_33, %c0_34] : memref<9x8x8xbf16, #tpu.memory_space<vmem>>, vector<1x8x8xbf16>
    %38 = vector.shape_cast %37 : vector<1x8x8xbf16> to vector<8x8xbf16>
    %cst_35 = arith.constant dense<0.000000e+00> : vector<8x324xf32>
    %39 = tpu.matmul %38, %36, %cst_35 {dimension_numbers = #tpu.dot_dimension_numbers<[1], [0], [0], [1], [0, 0, 1, 1], [], []>} : vector<8x8xbf16>, vector<8x324xbf16>, vector<8x324xf32> -> vector<8x324xf32>
    %40 = arith.addf %35, %39 : vector<8x324xf32>
    %c0_36 = arith.constant 0 : index
    %c20 = arith.constant 20 : index
    %41 = vector.load %arg10[%c0_36, %c20] : memref<8x384xbf16, #tpu.memory_space<vmem>>, vector<8x324xbf16>
    %c5 = arith.constant 5 : index
    %c0_37 = arith.constant 0 : index
    %c0_38 = arith.constant 0 : index
    %42 = vector.load %arg4[%c5, %c0_37, %c0_38] : memref<9x8x8xbf16, #tpu.memory_space<vmem>>, vector<1x8x8xbf16>
    %43 = vector.shape_cast %42 : vector<1x8x8xbf16> to vector<8x8xbf16>
    %cst_39 = arith.constant dense<0.000000e+00> : vector<8x324xf32>
    %44 = tpu.matmul %43, %41, %cst_39 {dimension_numbers = #tpu.dot_dimension_numbers<[1], [0], [0], [1], [0, 0, 1, 1], [], []>} : vector<8x8xbf16>, vector<8x324xbf16>, vector<8x324xf32> -> vector<8x324xf32>
    %45 = arith.addf %40, %44 : vector<8x324xf32>
    %c0_40 = arith.constant 0 : index
    %c36 = arith.constant 36 : index
    %46 = vector.load %arg10[%c0_40, %c36] : memref<8x384xbf16, #tpu.memory_space<vmem>>, vector<8x324xbf16>
    %c6 = arith.constant 6 : index
    %c0_41 = arith.constant 0 : index
    %c0_42 = arith.constant 0 : index
    %47 = vector.load %arg4[%c6, %c0_41, %c0_42] : memref<9x8x8xbf16, #tpu.memory_space<vmem>>, vector<1x8x8xbf16>
    %48 = vector.shape_cast %47 : vector<1x8x8xbf16> to vector<8x8xbf16>
    %cst_43 = arith.constant dense<0.000000e+00> : vector<8x324xf32>
    %49 = tpu.matmul %48, %46, %cst_43 {dimension_numbers = #tpu.dot_dimension_numbers<[1], [0], [0], [1], [0, 0, 1, 1], [], []>} : vector<8x8xbf16>, vector<8x324xbf16>, vector<8x324xf32> -> vector<8x324xf32>
    %50 = arith.addf %45, %49 : vector<8x324xf32>
    %c0_44 = arith.constant 0 : index
    %c37 = arith.constant 37 : index
    %51 = vector.load %arg10[%c0_44, %c37] : memref<8x384xbf16, #tpu.memory_space<vmem>>, vector<8x324xbf16>
    %c7 = arith.constant 7 : index
    %c0_45 = arith.constant 0 : index
    %c0_46 = arith.constant 0 : index
    %52 = vector.load %arg4[%c7, %c0_45, %c0_46] : memref<9x8x8xbf16, #tpu.memory_space<vmem>>, vector<1x8x8xbf16>
    %53 = vector.shape_cast %52 : vector<1x8x8xbf16> to vector<8x8xbf16>
    %cst_47 = arith.constant dense<0.000000e+00> : vector<8x324xf32>
    %54 = tpu.matmul %53, %51, %cst_47 {dimension_numbers = #tpu.dot_dimension_numbers<[1], [0], [0], [1], [0, 0, 1, 1], [], []>} : vector<8x8xbf16>, vector<8x324xbf16>, vector<8x324xf32> -> vector<8x324xf32>
    %55 = arith.addf %50, %54 : vector<8x324xf32>
    %c0_48 = arith.constant 0 : index
    %c38 = arith.constant 38 : index
    %56 = vector.load %arg10[%c0_48, %c38] : memref<8x384xbf16, #tpu.memory_space<vmem>>, vector<8x324xbf16>
    %c8 = arith.constant 8 : index
    %c0_49 = arith.constant 0 : index
    %c0_50 = arith.constant 0 : index
    %57 = vector.load %arg4[%c8, %c0_49, %c0_50] : memref<9x8x8xbf16, #tpu.memory_space<vmem>>, vector<1x8x8xbf16>
    %58 = vector.shape_cast %57 : vector<1x8x8xbf16> to vector<8x8xbf16>
    %cst_51 = arith.constant dense<0.000000e+00> : vector<8x324xf32>
    %59 = tpu.matmul %58, %56, %cst_51 {dimension_numbers = #tpu.dot_dimension_numbers<[1], [0], [0], [1], [0, 0, 1, 1], [], []>} : vector<8x8xbf16>, vector<8x324xbf16>, vector<8x324xf32> -> vector<8x324xf32>
    %60 = arith.addf %55, %59 : vector<8x324xf32>
    %c0_52 = arith.constant 0 : index
    %c0_53 = arith.constant 0 : index
    %61 = vector.load %arg7[%c0_52, %c0_53] : memref<8x1xf32, #tpu.memory_space<vmem>>, vector<8x1xf32>
    %62 = vector.broadcast %61 : vector<8x1xf32> to vector<8x324xf32>
    %63 = arith.addf %60, %62 : vector<8x324xf32>
    %cst_54 = arith.constant 0.000000e+00 : f32
    %64 = vector.broadcast %cst_54 : f32 to vector<8x324xf32>
    %65 = arith.maximumf %63, %64 : vector<8x324xf32>
    %66 = arith.truncf %65 : vector<8x324xf32> to vector<8x324xbf16>
    %c0_55 = arith.constant 0 : index
    %c0_56 = arith.constant 0 : index
    %67 = vector.load %arg5[%c0_55, %c0_56] : memref<32x8xbf16, #tpu.memory_space<vmem>>, vector<32x8xbf16>
    %cst_57 = arith.constant dense<0.000000e+00> : vector<32x324xf32>
    %68 = tpu.matmul %67, %66, %cst_57 {dimension_numbers = #tpu.dot_dimension_numbers<[1], [0], [0], [1], [0, 0, 1, 1], [], []>} : vector<32x8xbf16>, vector<8x324xbf16>, vector<32x324xf32> -> vector<32x324xf32>
    %c0_58 = arith.constant 0 : index
    %c0_59 = arith.constant 0 : index
    %69 = vector.load %arg8[%c0_58, %c0_59] : memref<32x1xf32, #tpu.memory_space<vmem>>, vector<32x1xf32>
    %70 = vector.broadcast %69 : vector<32x1xf32> to vector<32x324xf32>
    %71 = arith.addf %68, %70 : vector<32x324xf32>
    %72 = arith.extf %4 : vector<32x324xbf16> to vector<32x324xf32>
    %73 = arith.addf %71, %72 : vector<32x324xf32>
    %cst_60 = arith.constant 0.000000e+00 : f32
    %74 = vector.broadcast %cst_60 : f32 to vector<32x324xf32>
    %75 = arith.maximumf %73, %74 : vector<32x324xf32>
    %76 = arith.truncf %75 : vector<32x324xf32> to vector<32x324xbf16>
    %c0_61 = arith.constant 0 : index
    %c0_62 = arith.constant 0 : index
    %77 = vector.load %arg2[%c0_61, %c0_62] : memref<1x324xbf16, #tpu.memory_space<vmem>>, vector<1x324xbf16>
    %78 = vector.broadcast %77 : vector<1x324xbf16> to vector<32x324xbf16>
    %79 = arith.mulf %76, %78 : vector<32x324xbf16>
    %c0_63 = arith.constant 0 : index
    %c0_64 = arith.constant 0 : index
    %c0_65 = arith.constant 0 : index
    %80 = vector.load %arg9[%c0_63, %c0_64, %c0_65] : memref<1x32x324xbf16, #tpu.memory_space<vmem>>, vector<1x32x324xbf16>
    %81 = vector.shape_cast %80 : vector<1x32x324xbf16> to vector<32x324xbf16>
    %82 = vector.shape_cast %79 : vector<32x324xbf16> to vector<1x32x324xbf16>
    tpu.vector_store %arg9[%c0_63, %c0_64, %c0_65], %82 {strides = array<i32>} : memref<1x32x324xbf16, #tpu.memory_space<vmem>>, vector<1x32x324xbf16>,
    return
  }
  func.func @transform_0(%arg0: i32) -> (i32, i32, i32) {
    %c0_i32 = arith.constant 0 : i32
    %c0_i32_0 = arith.constant 0 : i32
    %c0_i32_1 = arith.constant 0 : i32
    return %arg0, %c0_i32, %c0_i32_0 : i32, i32, i32
  }
  func.func @transform_1(%arg0: i32) -> (i32, i32) {
    %c0_i32 = arith.constant 0 : i32
    %c0_i32_0 = arith.constant 0 : i32
    %c0_i32_1 = arith.constant 0 : i32
    return %c0_i32, %c0_i32_0 : i32, i32
  }
  func.func @transform_2(%arg0: i32) -> (i32, i32) {
    %c0_i32 = arith.constant 0 : i32
    %c0_i32_0 = arith.constant 0 : i32
    %c0_i32_1 = arith.constant 0 : i32
    return %c0_i32, %c0_i32_0 : i32, i32
  }
  func.func @transform_3(%arg0: i32) -> (i32, i32, i32) {
    %c0_i32 = arith.constant 0 : i32
    %c0_i32_0 = arith.constant 0 : i32
    %c0_i32_1 = arith.constant 0 : i32
    %c0_i32_2 = arith.constant 0 : i32
    return %c0_i32, %c0_i32_0, %c0_i32_1 : i32, i32, i32
  }
  func.func @transform_4(%arg0: i32) -> (i32, i32) {
    %c0_i32 = arith.constant 0 : i32
    %c0_i32_0 = arith.constant 0 : i32
    %c0_i32_1 = arith.constant 0 : i32
    return %c0_i32, %c0_i32_0 : i32, i32
  }
  func.func @transform_5(%arg0: i32) -> (i32, i32) {
    %c0_i32 = arith.constant 0 : i32
    %c0_i32_0 = arith.constant 0 : i32
    %c0_i32_1 = arith.constant 0 : i32
    return %c0_i32, %c0_i32_0 : i32, i32
  }
  func.func @transform_6(%arg0: i32) -> (i32, i32) {
    %c0_i32 = arith.constant 0 : i32
    %c0_i32_0 = arith.constant 0 : i32
    %c0_i32_1 = arith.constant 0 : i32
    return %c0_i32, %c0_i32_0 : i32, i32
  }
  func.func @transform_7(%arg0: i32) -> (i32, i32) {
    %c0_i32 = arith.constant 0 : i32
    %c0_i32_0 = arith.constant 0 : i32
    %c0_i32_1 = arith.constant 0 : i32
    return %c0_i32, %c0_i32_0 : i32, i32
  }
  func.func @transform_8(%arg0: i32) -> (i32, i32, i32) {
    %c0_i32 = arith.constant 0 : i32
    %c0_i32_0 = arith.constant 0 : i32
    %c0_i32_1 = arith.constant 0 : i32
    return %arg0, %c0_i32, %c0_i32_0 : i32, i32, i32
  }
}

</mosaic_0001>

<bundles_post_ra>
// kernel: tpu_custom_call.1
= control target key start
LH: loop header
LB: loop body
LE: loop exit
PB: predicated region body
PF: predicated region fallthrough
CT: control target
= control target key end

     0   :  { %s3326_s0 = inlined_call_operand.hbm [shape: bf16[2,32,324], index: 0, kind: input, shape index: {}]   ;;  %s3327_s1 = inlined_call_operand.hbm [shape: bf16[1,324], index: 1, kind: input, shape index: {}]   ;;  %s3328_s2 = inlined_call_operand.hbm [shape: bf16[8,32], index: 2, kind: input, shape index: {}]   ;;  %s3329_s3 = inlined_call_operand.hbm [shape: bf16[9,8,8], index: 3, kind: input, shape index: {}]   ;;  %s3330_s4 = inlined_call_operand.hbm [shape: bf16[32,8], index: 4, kind: input, shape index: {}]   ;;  %s3331_s5 = inlined_call_operand.hbm [shape: f32[8,1], index: 5, kind: input, shape index: {}]   ;;  %s3332_s6 = inlined_call_operand.hbm [shape: f32[8,1], index: 6, kind: input, shape index: {}]   ;;  %s3333_s7 = inlined_call_operand.hbm [shape: f32[32,1], index: 7, kind: input, shape index: {}]   ;;  %s3334_s8 = inlined_call_operand.hbm [shape: bf16[2,32,324], index: 8, kind: output, shape index: {}]  }
   0x1   :  { %3339 = sst [smem:[#allocation24_spill]] %s3327_s1 }
   0x2   :  { %3340 = sst [smem:[#allocation25_spill]] %s3328_s2 }
   0x3   :  { %13 = vsyncpa [#allocation4], 0 }
   0x4   :  { %15 = vsyncpa [#allocation4 + $0x1], 0 }
   0x5   :  { %16 = vsyncpa [#allocation7], 0 }
   0x6   :  { %17 = vsyncpa [#allocation10], 0 }
   0x7   :  { %18 = vsyncpa [#allocation13], 0 }
   0x8   :  { %19 = vsyncpa [#allocation16], 0 }
   0x9   :  { %20 = vsyncpa [#allocation5], 0 }
   0xa   :  { %22 = vsyncpa [#allocation5 + $0x1], 0  ;;  %s2771_s27 = smov 0   ;;  %s2773_s28 = smov 0  }
   0xb   :  { %s2775_s29 = smov 0   ;;  %s2777_s30 = smov 0  }
   0xc LB: > { %s2695_s9 = smov [#allocation6]   ;;  %s2792_s11 = sadd.s32 4294967295, %s2693_s30   ;;  %s2693_s30 = sphi %s2777_s30, %s3368_s30   ;;  %s2689_s29 = sphi %s2775_s29, %s3367_s29   ;;  %s2685_s28 = sphi %s2773_s28, %s3366_s28   ;;  %s2681_s27 = sphi %s2771_s27, %s3365_s27  }
   0xd   : > { %s245_s10 = sshll.u32 %s2695_s9, 4  ;;  %p2057_p0 = scmp.ge.s32.totalorder %s2693_s30, 1  ;;  %s2798_s10 = int_to_ptr.vmem [resolvable:$true] %s245_s10 }
   0xe   : > { %p3336_p1 = scmp.eq.s32.totalorder %s2792_s11, 0  ;;  %p232_p2 = scmp.lt.s32.totalorder %s2693_s30, 3 }
   0xf   : > { %s2696_s13 = smov [#allocation9]   ;;  %s2697_s16 = smov [#allocation12]  }
  0x10   : > { %p2800_p4 = pnand %p2057_p0, %p232_p2  ;;  %s266_s14 = sshll.u32 %s2696_s13, 4  ;;  %s2807_s14 = int_to_ptr.vmem [resolvable:$true] %s266_s14 }
  0x11   : > { %s293_s17 = sshll.u32 %s2697_s16, 4  ;;  %s3343_s1 = sld [smem:[#allocation24_spill]]  ;;  %s2815_s17 = int_to_ptr.vmem [resolvable:$true] %s293_s17 }
  0x12   : > { %s3341_s12 = scalar_select %p2800_p4, 1, 0 }
  0x13   : > { %p2265_p6 = pneg %p2800_p4 }
  0x15   : > { %p2811_p7 = pnand %p2265_p6, %p3336_p1 }
  0x17   : > { %s2385_s20 = scalar_lea.hbm %s3343_s1, 48  ;;  %p2825_p9 = pneg %p2811_p7 }
  0x18   : > { %p2386_p8 = scmp.ne.s32.totalorder %s3343_s1, %s2385_s20  ;;  %p2392_p12 = scmp.lt.u32.totalorder %s2385_s20, %s3343_s1 }
  0x1a   : > { %p2388_p10 = pnand %p2825_p9, %p2386_p8 }
  0x1c   : > { %p2389_p11 = pneg %p2388_p10 }
  0x1e   : > { %p2394_p13 = pnand %p2392_p12, %p2389_p11 }
  0x20   : > { %2397 = shalt.err (!%p2394_p13)
}
  0x21   : > { %s2398_s26 = scalar_lea.vmem %s2798_s10, 48  ;;  %s2405_s9 = scalar_lea.vmem %s2798_s10, 64 }
  0x22   : > { %p2399_p0 = scmp.ne.s32.totalorder %s2798_s10, %s2398_s26  ;;  %p2406_p8 = scmp.lt.s32.totalorder %s2798_s10, %s2798_s10 }
  0x23   : > { %p2407_p10 = scmp.lt.s32.totalorder %s2405_s9, %s2398_s26 }
  0x24   : > { %p2401_p2 = pnand %p2399_p0, %p2825_p9 }
  0x25   : > { %p2408_p5 = por %p2407_p10, %p2406_p8 }
  0x26   : > { %p2402_p6 = pneg %p2401_p2 }
  0x28   : > { %p2409_p3 = pnand %p2408_p5, %p2402_p6 }
  0x2a   : > { %2412 = shalt.err (!%p2409_p3)
}
  0x2b   : > { %2268 = dma.hbm_to_vmem [thread:$0]  (!%p2811_p7), %s3343_s1, 48, %s2798_s10, [#allocation7]  }
  0x2c   : > { %s2413_s20 = scalar_lea.hbm %s3329_s3, 576 }
  0x2d   : > { %p2414_p11 = scmp.ne.s32.totalorder %s3329_s3, %s2413_s20  ;;  %p2420_p3 = scmp.lt.u32.totalorder %s2413_s20, %s3329_s3 }
  0x2f   : > { %p2416_p12 = pnand %p2414_p11, %p2825_p9 }
  0x31   : > { %p2417_p5 = pneg %p2416_p12 }
  0x33   : > { %p2422_p13 = pnand %p2420_p3, %p2417_p5 }
  0x35   : > { %2425 = shalt.err (!%p2422_p13)
}
  0x36   : > { %s2426_s10 = scalar_lea.vmem %s2807_s14, 576  ;;  %p2434_p8 = scmp.lt.s32.totalorder %s2807_s14, %s2807_s14 }
  0x37   : > { %p2427_p0 = scmp.ne.s32.totalorder %s2807_s14, %s2426_s10  ;;  %p2435_p10 = scmp.lt.s32.totalorder %s2426_s10, %s2426_s10 }
  0x39   : > { %p2429_p2 = pnand %p2427_p0, %p2825_p9  ;;  %p2436_p11 = por %p2435_p10, %p2434_p8 }
  0x3b   : > { %p2430_p6 = pneg %p2429_p2 }
  0x3d   : > { %p2437_p12 = pnand %p2436_p11, %p2430_p6 }
  0x3f   : > { %2440 = shalt.err (!%p2437_p12)
}
  0x40   : > { %s3335_s26 = smov 64   ;;  %s2699_s9 = smov 4  }
  0x41   : > { %2274 = dma.hbm_to_vmem [thread:$0]  (!%p2811_p7), %s3329_s3, 576, %s2807_s14, [#allocation10], %s3335_s26, %s3335_s26, %s2699_s9  }
  0x42   : > { %s2441_s20 = scalar_lea.hbm %s3331_s5, 128 }
  0x43   : > { %p2442_p5 = scmp.ne.s32.totalorder %s3331_s5, %s2441_s20  ;;  %p2448_p0 = scmp.lt.u32.totalorder %s2441_s20, %s3331_s5 }
  0x45   : > { %p2444_p3 = pnand %p2442_p5, %p2825_p9 }
  0x47   : > { %p2445_p13 = pneg %p2444_p3 }
  0x49   : > { %p2450_p2 = pnand %p2448_p0, %p2445_p13 }
  0x4b   : > { %2453 = shalt.err (!%p2450_p2)
}
  0x4c   : > { %s2454_s14 = scalar_lea.vmem %s2815_s17, 128  ;;  %p2462_p11 = scmp.lt.s32.totalorder %s2815_s17, %s2815_s17 }
  0x4d   : > { %p2455_p6 = scmp.ne.s32.totalorder %s2815_s17, %s2454_s14  ;;  %p2463_p12 = scmp.lt.s32.totalorder %s2454_s14, %s2454_s14 }
  0x4f   : > { %p2457_p8 = pnand %p2455_p6, %p2825_p9  ;;  %p2464_p5 = por %p2463_p12, %p2462_p11 }
  0x51   : > { %p2458_p10 = pneg %p2457_p8 }
  0x53   : > { %p2465_p3 = pnand %p2464_p5, %p2458_p10 }
  0x55   : > { %2468 = shalt.err (!%p2465_p3)
}
  0x56   : > { %2280 = dma.hbm_to_vmem [thread:$0]  (!%p2811_p7), %s3331_s5, 128, %s2815_s17, [#allocation13]  }
  0x57   : > { %s2700_s16 = smov [#allocation8]   ;;  %s2701_s19 = smov [#allocation11]  }
  0x58   : > { %s256_s18 = sshll.u32 %s2700_s16, 4  ;;  %s279_s20 = sshll.u32 %s2701_s19, 4  ;;  %s257_s18 = int_to_ptr.vmem [resolvable:$true] %s256_s18  ;;  %s280_s20 = int_to_ptr.vmem [resolvable:$true] %s279_s20 }
  0x59   : > { %s3345_s2 = sld [smem:[#allocation25_spill]] }
  0x5f   : > { %s2469_s24 = scalar_lea.hbm %s3345_s2, 64 }
  0x60   : > { %p2470_p13 = scmp.ne.s32.totalorder %s3345_s2, %s2469_s24  ;;  %p2476_p6 = scmp.lt.u32.totalorder %s2469_s24, %s3345_s2 }
  0x62   : > { %p2472_p0 = pnand %p2470_p13, %p2825_p9 }
  0x64   : > { %p2473_p2 = pneg %p2472_p0 }
  0x66   : > { %p2478_p8 = pnand %p2476_p6, %p2473_p2 }
  0x68   : > { %2481 = shalt.err (!%p2478_p8)
}
  0x69   : > { %s2482_s17 = scalar_lea.vmem %s257_s18, 64  ;;  %p2490_p5 = scmp.lt.s32.totalorder %s257_s18, %s257_s18 }
  0x6a   : > { %p2483_p10 = scmp.ne.s32.totalorder %s257_s18, %s2482_s17  ;;  %p2491_p3 = scmp.lt.s32.totalorder %s2482_s17, %s2482_s17 }
  0x6c   : > { %p2485_p11 = pnand %p2483_p10, %p2825_p9  ;;  %p2492_p1 = por %p2491_p3, %p2490_p5 }
  0x6e   : > { %p2486_p12 = pneg %p2485_p11 }
  0x70   : > { %p2493_p4 = pnand %p2492_p1, %p2486_p12 }
  0x72   : > { %2496 = shalt.err (!%p2493_p4)
}
  0x73   : > { %2271 = dma.hbm_to_vmem [thread:$0]  (!%p2811_p7), %s3345_s2, 64, %s257_s18, [#allocation7]  }
  0x74   : > { %s2497_s21 = scalar_lea.hbm %s3330_s4, 256 }
  0x75   : > { %p2498_p13 = scmp.ne.s32.totalorder %s3330_s4, %s2497_s21  ;;  %p2504_p4 = scmp.lt.u32.totalorder %s2497_s21, %s3330_s4 }
  0x77   : > { %p2500_p0 = pnand %p2498_p13, %p2825_p9 }
  0x79   : > { %p2501_p1 = pneg %p2500_p0 }
  0x7b   : > { %p2506_p2 = pnand %p2504_p4, %p2501_p1 }
  0x7d   : > { %2509 = shalt.err (!%p2506_p2)
}
  0x7e   : > { %s2510_s10 = scalar_lea.vmem %s280_s20, 256  ;;  %p2518_p11 = scmp.lt.s32.totalorder %s280_s20, %s280_s20 }
  0x7f   : > { %p2511_p6 = scmp.ne.s32.totalorder %s280_s20, %s2510_s10  ;;  %p2519_p12 = scmp.lt.s32.totalorder %s2510_s10, %s2510_s10 }
  0x81   : > { %p2513_p8 = pnand %p2511_p6, %p2825_p9  ;;  %p2520_p5 = por %p2519_p12, %p2518_p11 }
  0x83   : > { %p2514_p10 = pneg %p2513_p8 }
  0x85   : > { %p2521_p3 = pnand %p2520_p5, %p2514_p10 }
  0x87   : > { %2524 = shalt.err (!%p2521_p3)
}
  0x88   : > { %s3346_s18 = smov 64   ;;  %s2702_s16 = smov [#allocation14]  }
  0x89   : > { %2277 = dma.hbm_to_vmem [thread:$0]  (!%p2811_p7), %s3330_s4, 256, %s280_s20, [#allocation10], %s3346_s18, %s3346_s18, %s2699_s9  }
  0x8a   : > { %s304_s26 = sshll.u32 %s2702_s16, 4  ;;  %s2703_s19 = smov [#allocation15]   ;;  %s305_s26 = int_to_ptr.vmem [resolvable:$true] %s304_s26 }
  0x8b   : > { %s314_s21 = sshll.u32 %s2703_s19, 4  ;;  %s2525_s25 = scalar_lea.hbm %s3332_s6, 128  ;;  %s315_s21 = int_to_ptr.vmem [resolvable:$true] %s314_s21 }
  0x8c   : > { %p2526_p13 = scmp.ne.s32.totalorder %s3332_s6, %s2525_s25  ;;  %p2532_p4 = scmp.lt.u32.totalorder %s2525_s25, %s3332_s6 }
  0x8e   : > { %p2528_p0 = pnand %p2526_p13, %p2825_p9 }
  0x90   : > { %p2529_p1 = pneg %p2528_p0 }
  0x92   : > { %p2534_p2 = pnand %p2532_p4, %p2529_p1 }
  0x94   : > { %2537 = shalt.err (!%p2534_p2)
}
  0x95   : > { %s2538_s9 = scalar_lea.vmem %s305_s26, 128  ;;  %p2546_p11 = scmp.lt.s32.totalorder %s305_s26, %s305_s26 }
  0x96   : > { %p2539_p6 = scmp.ne.s32.totalorder %s305_s26, %s2538_s9  ;;  %p2547_p12 = scmp.lt.s32.totalorder %s2538_s9, %s2538_s9 }
  0x98   : > { %p2541_p8 = pnand %p2539_p6, %p2825_p9  ;;  %p2548_p5 = por %p2547_p12, %p2546_p11 }
  0x9a   : > { %p2542_p10 = pneg %p2541_p8 }
  0x9c   : > { %p2549_p3 = pnand %p2548_p5, %p2542_p10 }
  0x9e   : > { %2552 = shalt.err (!%p2549_p3)
}
  0x9f   : > { %2283 = dma.hbm_to_vmem [thread:$0]  (!%p2811_p7), %s3332_s6, 128, %s305_s26, [#allocation13]  }
  0xa0   : > { %s2553_s16 = scalar_lea.hbm %s3333_s7, 512 }
  0xa1   : > { %p2554_p13 = scmp.ne.s32.totalorder %s3333_s7, %s2553_s16  ;;  %p2560_p4 = scmp.lt.u32.totalorder %s2553_s16, %s3333_s7 }
  0xa3   : > { %p2556_p0 = pnand %p2554_p13, %p2825_p9 }
  0xa5   : > { %p2557_p1 = pneg %p2556_p0 }
  0xa7   : > { %p2562_p2 = pnand %p2560_p4, %p2557_p1 }
  0xa9   : > { %2565 = shalt.err (!%p2562_p2)
}
  0xaa   : > { %s2566_s14 = scalar_lea.vmem %s315_s21, 512  ;;  %p2574_p11 = scmp.lt.s32.totalorder %s315_s21, %s315_s21 }
  0xab   : > { %p2567_p6 = scmp.ne.s32.totalorder %s315_s21, %s2566_s14  ;;  %p2575_p12 = scmp.lt.s32.totalorder %s2566_s14, %s2566_s14 }
  0xad   : > { %p2569_p8 = pnand %p2567_p6, %p2825_p9  ;;  %p2576_p5 = por %p2575_p12, %p2574_p11 }
  0xaf   : > { %p2570_p10 = pneg %p2569_p8 }
  0xb1   : > { %p2577_p3 = pnand %p2576_p5, %p2570_p10 }
  0xb3   : > { %2580 = shalt.err (!%p2577_p3)
}
  0xb4   : > { %s2704_s26 = smov 128   ;;  %s2705_s23 = smov 8  }
  0xb5   : > { %2286 = dma.hbm_to_vmem [thread:$0]  (!%p2811_p7), %s3333_s7, 512, %s315_s21, [#allocation16], %s2704_s26, %s2704_s26, %s2705_s23  }
  0xb6   : > { %s2056_s9 = sadd.s32 4294967294, %s2693_s30   ;;  %s2973_s20 = sadd.s32 1, %s2693_s30  }
  0xb7   : > { %s35_s18 = sadd.s32 1, %s2689_s29  ;;  %s32_s1 = ssub.s32 %s2693_s30, %s2973_s20 }
  0xb8   : > { %p42_p9 = scmp.ne.s32.totalorder %s2689_s29, %s2685_s28  ;;  %p33_p13 = scmp.eq.s32.totalorder %s32_s1, 0 }
  0xb9   : > { %p43_p0 = scmp.eq.s32.totalorder %s2693_s30, 0  ;;  %p48_p1 = scmp.ne.s32.totalorder %s2685_s28, %s2681_s27 }
  0xba   : > { %p219_p4 = scmp.eq.s32.totalorder %s2792_s11, 1  ;;  %p3347_p6 = scmp.eq.s32.totalorder %s2792_s11, 0 }
  0xbb   : > { %s2985_s13 = scalar_select %p33_p13, %s2689_s29, %s35_s18  }
  0xbc   : > { %p44_p2 = por %p43_p0, %p42_p9  ;;  %p2989_p8 = por %p3347_p6, %p48_p1 }
  0xbd   : > { %p2993_p7 = por %p219_p4, %p42_p9  ;;  %p225_p10 = scmp.eq.s32.totalorder %s2056_s9, 1 }
  0xbe   : > { %p2302_p11 = scmp.lt.s32.totalorder %s2693_s30, 2  ;;  %s328_s16 = sand.u32 1, %s2689_s29  }
  0xbf   : > { %s3349_s21 = scalar_select %p2993_p7, 1, 0 }
  0xc0   : > { %p2999_p12 = por %p225_p10, %p48_p1  ;;  %s2229_s22 = smul.u32 48, %s328_s16 }
  0xc1   : > { %p3003_p5 = pnand %p2302_p11, %p44_p2  ;;  %s2230_s25 = smul.u32 768, %s2693_s30 }
  0xc2   : > { %s3350_s19 = scalar_select %p2999_p12, 1, 0 }
  0xc3   : > { %s3011_s23 = scalar_lea.hbm %s3326_s0, %s2230_s25  ;;  %s332_s10 = scalar_lea.vmem [#allocation3], %s2229_s22 }
  0xc4   : > { %s339_s17 = sshll.u32 %s332_s10, 4  ;;  %s3015_s9 = scalar_lea.sflag [#allocation4], %s328_s16  ;;  %s3013_s17 = int_to_ptr.vmem [resolvable:$true] %s339_s17 }
  0xc5   : > { %s2581_s18 = scalar_lea.hbm %s3011_s23, 768  ;;  %p2583_p9 = pneg %p3003_p5 }
  0xc6   : > { %p2582_p3 = scmp.ne.s32.totalorder %s3011_s23, %s2581_s18  ;;  %s2586_s14 = scalar_lea.hbm %s3326_s0, 1536 }
  0xc7   : > { %p2587_p1 = scmp.lt.u32.totalorder %s3011_s23, %s3326_s0  ;;  %p2588_p4 = scmp.lt.u32.totalorder %s2586_s14, %s2581_s18 }
  0xc8   : > { %p2584_p13 = pnand %p2583_p9, %p2582_p3  ;;  %p2590_p6 = scmp.lt.u32.totalorder %s2581_s18, %s3011_s23 }
  0xc9   : > { %p2589_p2 = por %p2588_p4, %p2587_p1 }
  0xca   : > { %p2585_p0 = pneg %p2584_p13 }
  0xcb   : > { %p2591_p10 = por %p2590_p6, %p2589_p2 }
  0xcd   : > { %p2592_p11 = pnand %p2591_p10, %p2585_p0 }
  0xcf   : > { %2595 = shalt.err (!%p2592_p11)
}
  0xd0   : > { %s2596_s16 = scalar_lea.vmem %s3013_s17, 768  ;;  %s2706_s22 = smov [#allocation3]  }
  0xd1   : > { %p2597_p3 = scmp.ne.s32.totalorder %s3013_s17, %s2596_s16  ;;  %s2601_s10 = sshll.u32 %s2706_s22, 4  ;;  %s2602_s10 = int_to_ptr.vmem [resolvable:$false] %s2601_s10 }
  0xd2   : > { %s2603_s2 = scalar_lea.vmem %s2602_s10, 1536  ;;  %p2604_p7 = scmp.lt.s32.totalorder %s3013_s17, %s2602_s10 }
  0xd3   : > { %p2599_p13 = pnand %p2597_p3, %p2583_p9  ;;  %p2605_p1 = scmp.lt.s32.totalorder %s2603_s2, %s2596_s16 }
  0xd5   : > { %p2600_p12 = pneg %p2599_p13  ;;  %p2606_p4 = por %p2605_p1, %p2604_p7 }
  0xd7   : > { %p2607_p2 = pnand %p2606_p4, %p2600_p12 }
  0xd9   : > { %2610 = shalt.err (!%p2607_p2)
}
  0xda   : > { %s2707_s18 = smov 192   ;;  %s2708_s1 = smov 12  }
  0xdb   : > { %2290 = dma.hbm_to_vmem [thread:$0]  (!%p3003_p5), %s3011_s23, 768, %s3013_s17, %s3015_s9, %s2707_s18, %s2707_s18, %s2708_s1  }
  0xdc   : > { %p3352_p9 = scmp.ne.s32.totalorder %s3341_s12, 0 }
  0xdd   : > { %s3046_s25 = sand.u32 (!%p3352_p9), 1, %s2685_s28  }
  0xde   : > { %351 = sbr.rel (%p3352_p9) target bundleno = 1278 (0x4fe), region = 52  ;;  %s354_s26 = scalar_lea.sflag (!%p3352_p9), [#allocation4], %s3046_s25 }
  0xdf   : > { %s2231_s14 = smul.u32 (!%p3352_p9), 48, %s3046_s25 }
  0xe1   : > { %s3050_s16 = scalar_lea.vmem (!%p3352_p9), [#allocation3], %s2231_s14 }
  0xe5   : > { %2656 = dma.done.wait (%p2989_p8), %s354_s26, 768  }
  0xe6   : > { %2658 = vsyncadd (%p2989_p8), %s354_s26, 4294966528  ;;  %p3353_p7 = scmp.eq.s32.totalorder %s2792_s11, 0 }
  0xe8   : > { %2660 = dma.done.wait (%p3353_p7), [#allocation7], 112   ;;  %p3354_p12 = pmov %p3353_p7 }
  0xe9   : > { %p3355_p5 = pmov %p3353_p7 }
  0xea   : > { %2662 = vsyncadd (%p3354_p12), [#allocation7], 4294967184 }
  0xeb   : > { %2664 = dma.done.wait (%p3355_p5), [#allocation10], 832   ;;  %p3356_p0 = pmov %p3355_p5 }
  0xed   : > { %2666 = vsyncadd (%p3356_p0), [#allocation10], 4294966464  ;;  %p3357_p6 = pmov %p3356_p0 }
  0xee   : > { %p3358_p10 = pmov %p3356_p0 }
  0xef   : > { %2668 = dma.done.wait (%p3357_p6), [#allocation13], 256  }
  0xf0   : > { %2670 = vsyncadd (%p3358_p10), [#allocation13], 4294967040  ;;  %p3359_p8 = pmov %p3356_p0 }
  0xf1   : > { %p3360_p11 = pmov %p3356_p0 }
  0xf2   : > { %2672 = dma.done.wait (%p3359_p8), [#allocation16], 512  }
  0xf3   : > { %2674 = vsyncadd (%p3360_p11), [#allocation16], 4294966784  ;;  %s3072_s12 = scalar_lea.vmem [#allocation17], %s2231_s14  ;;  %p3361_p3 = scmp.ne.s32.totalorder %s2792_s11, 0 }
  0xf4   : > { %v2709_v0 = vmov (!%p3361_p3), 0  }
  0xf5   : > { %422 = sbr.rel (%p3361_p3) target bundleno = 252 (0xfc), region = 88  ;;  %423 = vst [vmem:[#allocation2] sm:$0xff] (!%p3361_p3), %v2709_v0  ;;  %424 = vst [vmem:[#allocation2 + $0x8] sm:$0xf] (!%p3361_p3), %v2709_v0 }
  0xfc PF: > { %v3077_v1 = vld [vmem:[%s3050_s16] sm:$0xff]  ;;  %v3080_v2 = vld [vmem:[%s3050_s16 + $0xc] sm:$0xff]  ;;  %v3083_v3 = vld [vmem:[%s3050_s16 + $0x8] sm:$0xf]  ;;  %v2710_v6 = vmov 0.0   ;;  %v2711_v10 = vmov 0   ;;  %v576_v21 = vlaneseq }
  0xfd   : > { %v2077_v4 = vcombine.high %v3077_v1, %v3080_v2  ;;  %v2076_v5 = vcombine.low %v3077_v1, %v3080_v2  ;;  %2160 = vmatprep.subr.bf16.mxu1 %v2710_v6  ;;  %v3091_v7 = vld [vmem:[%s3050_s16 + $0x14] sm:$0xf]  ;;  %v3094_v8 = vld [vmem:[%s3050_s16 + $0x18] sm:$0xff]  ;;  %v3097_v9 = vld [vmem:[%s3050_s16 + $0x24] sm:$0xff]  ;;  %508 = vmatprep.mubr.bf16.mxu0 %v2711_v10  ;;  %vm2712_vm0 = vmmov 0   ;;  %vm472_vm1 = vcmask 261120  }
  0xfe   : > { %v2078_v11 = vcombine.low %v3083_v3, %v3091_v7  ;;  %v2080_v12 = vcombine.high %v3094_v8, %v3097_v9  ;;  %v3105_v13 = vld [vmem:[%s3050_s16 + $0x20] sm:$0xf]  ;;  %v3108_v14 = vld [vmem:[%s3050_s16 + $0x2c] sm:$0xf]  ;;  %2372 = vset.pattern.permute.xlu0 %v2711_v10  ;;  %2373 = vset.pattern.permute.xlu1 %v2711_v10  ;;  %v2079_v16 = vcombine.low %v3094_v8, %v3097_v9  ;;  %v433_v18 = vld [vmem:[#allocation8] sm:$0xf] }
  0xff   : > { %476 = vmatprep.subr.bf16.mxu0 %v2077_v4  ;;  %v434_v15 = vld [vmem:[#allocation12] sm:$0xff]  ;;  %v2081_v17 = vcombine.low %v3105_v13, %v3108_v14  ;;  %2164 = vmatprep.mubr.msk.bf16.mxu1 %vm2712_vm0, %v2710_v6  ;;  %v2713_v19 = vmov 1966171168   ;;  %v577_v23 = vshrl.u32 %v576_v21, 7  ;;  %s2714_s15 = smov 19   ;;  %vm630_vm2 = vcmask 1043608  }
 0x100   : > { %477 = vmatpush1.bf16.msra.mxu0 %v2076_v5  ;;  %2161 = vmatpush3.bf16.msra.mxu1 %v2078_v11  ;;  %v574_v20 = vunpack.c.l.s4 %v2713_v19  ;;  %v2084_v25 = vld.sshfl [vmem:[#allocation6] sm:$0x13 pattern:$0x75316420]  ;;  %vm631_vm3 = vcmask 1047556   ;;  %vm625_vm4 = vcmask 154624  }
 0x101   : > { %478 = vmatprep.subr.bf16.mxu0 %v2080_v12  ;;  %2162 = vmatprep.subr.bf16.mxu1 %v2710_v6  ;;  %v572_v27 = vcombine.high %v2084_v25, %v2084_v25  ;;  %v593_v32 = vsub.s32 0, %v577_v23  ;;  %vm632_vm5 = vmor %vm631_vm3, %vm630_vm2  ;;  %vm634_vm6 = vcmask 707584   ;;  %s2715_s24 = smov 127   ;;  %s2716_s23 = smov 126   ;;  %v1617_v19 = vld [vmem:[#allocation15 + $0x18] sm:$0xff]  ;;  %vm655_vm7 = vcmask 1039360  }
 0x102   : > { %437 = vperm.xlu0 %2372, %v434_v15   ;;  %v575_v22 = vunpack.c.0.s8 %v574_v20  ;;  %s2717_s17 = smov 110   ;;  %s2718_s9 = smov 109   ;;  %v1614_v15 = vld [vmem:[#allocation15] sm:$0xff]  ;;  %vm662_vm8 = vcmask 1043456   ;;  %vm658_vm9 = vcmask 64512   ;;  %vm854_vm10 = vcmask 1031168  }
 0x103   : > { %s2719_s22 = smov 108   ;;  %s2720_s10 = smov 92   ;;  %vm961_vm11 = vcmask 900096   ;;  %vm1068_vm12 = vcmask 891904   ;;  %vm1175_vm13 = vcmask 883712   ;;  %vm1282_vm14 = vcmask 752640  }
 0x104   : > { %479 = vmatpush1.bf16.msra.mxu0 %v2079_v16  ;;  %2163 = vmatpush3.bf16.msra.mxu1 %v2081_v17  ;;  %v578_v24 = vsub.s32 %v575_v22, %v577_v23  ;;  %s2721_s2 = smov 91   ;;  %s2722_s18 = smov 90   ;;  %v1616_v16 = vld [vmem:[#allocation15 + $0x10] sm:$0xff]  ;;  %v1595_v17 = vld [vmem:[#allocation14] sm:$0xff]  ;;  %vm1389_vm15 = vcmask 744448  }
 0x105   : > { %2168 = vmatprep.subr.bf16.mxu1 %v2710_v6  ;;  %s2232_s1 = smul.u32 768, %s2792_s11  ;;  %s1916_s14 = sshll.u32 %s3072_s12, 4  ;;  %s3280_s14 = int_to_ptr.vmem [resolvable:$true] %s1916_s14 }
 0x106   : > { %v579_v26 = vrot.slane %v2084_v25, %v578_v24  ;;  %v586_v29 = vrot.slane %v572_v27, %v578_v24  ;;  %s1903_s11 = scalar_lea.sflag [#allocation5], %s3046_s25  ;;  %p3362_p1 = scmp.ne.s32.totalorder %s3349_s21, 0 }
 0x107   : > { %2082 = vmatmul.mubr.msk.bf16.vlgmr.msra.gmra.mrb[0].mxu0 %vm472_vm1, %v433_v18  ;;  %2165 = vmatmul.mubr.msk.bf16.vlgmr.msra.gmra.mrb[0].mxu1 %vm472_vm1, %v433_v18  ;;  %v1615_v18 = vld [vmem:[#allocation15 + $0x8] sm:$0xff]  ;;  %vm1496_vm1 = vcmask 736256  }
 0x108   : > { %2170 = vmatprep.mubr.msk.bf16.mxu1 %vm2712_vm0, %v2710_v6  ;;  %704 = vmatprep.mubr.bf16.mxu0 %v2711_v10  ;;  %v587_v28 = vcombine.high %v579_v26, %v579_v26  ;;  %v589_v31 = vpack.i.b16 %v579_v26, %v579_v26  ;;  %v596_v35 = vpack.i.b16 %v586_v29, %v586_v29 }
 0x10a   : > { %v603_v33 = vpack.i.b16 %v587_v28, %v587_v28  ;;  %v3123_v45 = vrot.slane %v589_v31, %v593_v32  ;;  %v3127_v51 = vrot.slane %v596_v35, %v593_v32  ;;  %v640_v28 = vld [vmem:[#allocation9 + $0x4] sm:$0xf] }
 0x10c   : > { %v3125_v49 = vrot.slane %v603_v33, %v593_v32 }
 0x181   : > { %v438_v30 = vpop.permute.xlu0 %437 }
 0x1da   : > { %v510_v34 = vpop.f32.mrb[0].mxu0  ;;  %v551_v36 = vpop.f32.mrb[0].mxu1 }
 0x1db   : > { %v511_v37 = vadd.f32 %v510_v34, %v438_v30  ;;  %v512_v38 = vpop.f32.mrb[1].mxu0  ;;  %v552_v39 = vadd.f32 %v551_v36, %v438_v30  ;;  %v2166_v40 = vpop.f32.mrb[1].mxu1  ;;  %v638_v36 = vld [vmem:[#allocation9] sm:$0xf] }
 0x1dc   : > { %v513_v41 = vadd.f32 %v512_v38, %v438_v30  ;;  %v514_v42 = vpop.f32.mrb[2].mxu0  ;;  %v554_v43 = vpop.f32.mrb[2].mxu1 }
 0x1dd   : > { %v557_v44 = vmax.f32 %v511_v37, 0.0  ;;  %v559_v46 = vmax.f32 %v552_v39, 0.0  ;;  %v515_v47 = vpop.f32.mrb[3].mxu0  ;;  %v2167_v48 = vpop.f32.mrb[3].mxu1 }
 0x1de   : > { %v558_v50 = vmax.f32 %v513_v41, 0.0 }
 0x1df   : > { %v560_v52 = vpack.c.bf16 %v557_v44, %v557_v44  ;;  %v562_v53 = vpack.c.bf16 %v559_v46, %v559_v46  ;;  %v847_v46 = vld [vmem:[#allocation9 + $0x8] sm:$0xf] }
 0x1e0   : > { %v561_v54 = vpack.c.bf16 %v558_v50, %v558_v50 }
 0x1e1   : > { %v609_v55 = vmul.bf16 %v3123_v45, %v560_v52  ;;  %v611_v56 = vmul.bf16 %v3125_v49, %v562_v53 }
 0x1e2   : > { %v610_v57 = vmul.bf16 %v3127_v51, %v561_v54 }
 0x1e3   : > { %v2086_v58 = vcombine.low %v611_v56, %v611_v56  ;;  %v954_v56 = vld [vmem:[#allocation9 + $0xc] sm:$0xf] }
 0x1e4   : > { %v2085_v59 = vcombine.low %v609_v55, %v610_v57 }
 0x1e5   : > { %622 = vrot.lane.b32.xlu1 %v2086_v58, %s2714_s15 }
 0x1e6   : > { %620 = vrot.lane.b32.xlu0 %v2085_v59, %s2714_s15  ;;  %s3278_s15 = scalar_lea.hbm %s3334_s8, %s2232_s1 }
 0x257   : > { %v623_v62 = vpop.permute.xlu1 %622 }
 0x258   : > { %v621_v60 = vpop.permute.xlu0 %620 }
 0x259   : > { %v624_v61 = vrot.slane %v621_v60, 4 }
 0x25b   : > { %v626_v63 = vsel %vm625_vm4, %v624_v61, %v621_v60  ;;  %v627_v0 = vsel %vm625_vm4, %v624_v61, %v623_v62 }
 0x25c   : > { %633 = vst.msk [vmem:[#allocation2] sm:$0xff] %vm632_vm5, %v626_v63 }
 0x25d   : > { %635 = vst.msk [vmem:[#allocation2 + $0x8] sm:$0xf] %vm634_vm6, %v627_v0  ;;  %v1061_v0 = vld [vmem:[#allocation9 + $0x10] sm:$0xf] }
 0x263   : > { %v636_v4 = vld [vmem:[#allocation2] sm:$0xff] }
 0x264   : > { %v3132_v5 = vcombine.low %v636_v4, %v636_v4  ;;  %v2088_v11 = vcombine.high %v636_v4, %v636_v4  ;;  %v2382_v12 = vld [vmem:[#allocation2 + $0x8] ss:$0 sps:$4 sm:$0xff]  }
 0x265   : > { %v763_v31 = vsel %vm662_vm8, %v2382_v12, 0 }
 0x266   : > { %651 = vrot.lane.b32.xlu0 %v2088_v11, %s2715_s24  ;;  %649 = vrot.lane.b32.xlu1 %v3132_v5, %s2715_s24  ;;  %v757_v32 = vsel %vm662_vm8, %v3132_v5, 0 }
 0x26a   : > { %848 = vrot.lane.b32.xlu0 %v3132_v5, %s2716_s23  ;;  %653 = vrot.lane.b32.xlu1 %v2382_v12, %s2715_s24  ;;  %s2611_s24 = scalar_lea.vmem %s3280_s14, 768 }
 0x26b   : > { %p2612_p13 = scmp.ne.s32.totalorder %s3280_s14, %s2611_s24 }
 0x26d   : > { %p2613_p4 = pnand %p2612_p13, %p3362_p1 }
 0x26e   : > { %852 = vrot.lane.b32.xlu0 %v2382_v12, %s2716_s23  ;;  %850 = vrot.lane.b32.xlu1 %v2088_v11, %s2716_s23  ;;  %s2723_s23 = smov [#allocation17]  }
 0x26f   : > { %p2614_p2 = pneg %p2613_p4 }
 0x272   : > { %957 = vrot.lane.b32.xlu0 %v2088_v11, %s2717_s17  ;;  %955 = vrot.lane.b32.xlu1 %v3132_v5, %s2717_s17 }
 0x276   : > { %1062 = vrot.lane.b32.xlu0 %v3132_v5, %s2718_s9  ;;  %959 = vrot.lane.b32.xlu1 %v2382_v12, %s2717_s17  ;;  %s2615_s17 = sshll.u32 %s2723_s23, 4  ;;  %s2616_s17 = int_to_ptr.vmem [resolvable:$false] %s2615_s17 }
 0x277   : > { %p2618_p9 = scmp.lt.s32.totalorder %s3280_s14, %s2616_s17 }
 0x27a   : > { %1066 = vrot.lane.b32.xlu0 %v2382_v12, %s2718_s9  ;;  %1064 = vrot.lane.b32.xlu1 %v2088_v11, %s2718_s9  ;;  %s2617_s9 = scalar_lea.vmem %s2616_s17, 1536 }
 0x27b   : > { %p2619_p7 = scmp.lt.s32.totalorder %s2617_s9, %s2611_s24 }
 0x27d   : > { %p2620_p12 = por %p2619_p7, %p2618_p9 }
 0x27e   : > { %1171 = vrot.lane.b32.xlu0 %v2088_v11, %s2719_s22  ;;  %1169 = vrot.lane.b32.xlu1 %v3132_v5, %s2719_s22 }
 0x27f   : > { %p2621_p5 = pnand %p2620_p12, %p2614_p2 }
 0x282   : > { %1276 = vrot.lane.b32.xlu0 %v3132_v5, %s2720_s10  ;;  %1173 = vrot.lane.b32.xlu1 %v2382_v12, %s2719_s22 }
 0x286   : > { %1280 = vrot.lane.b32.xlu0 %v2382_v12, %s2720_s10  ;;  %1278 = vrot.lane.b32.xlu1 %v2088_v11, %s2720_s10 }
 0x28a   : > { %1385 = vrot.lane.b32.xlu0 %v2088_v11, %s2721_s2  ;;  %1383 = vrot.lane.b32.xlu1 %v3132_v5, %s2721_s2 }
 0x28e   : > { %1490 = vrot.lane.b32.xlu0 %v3132_v5, %s2722_s18  ;;  %1387 = vrot.lane.b32.xlu1 %v2382_v12, %s2721_s2 }
 0x292   : > { %1494 = vrot.lane.b32.xlu0 %v2382_v12, %s2722_s18  ;;  %1492 = vrot.lane.b32.xlu1 %v2088_v11, %s2722_s18 }
 0x296   : > { %1620 = vperm.xlu0 %2372, %v1614_v15   ;;  %1598 = vperm.xlu1 %2373, %v1595_v17   ;;  %v1168_v17 = vld [vmem:[#allocation9 + $0x14] sm:$0xf] }
 0x29a   : > { %1630 = vperm.xlu0 %2372, %v1616_v16   ;;  %1625 = vperm.xlu1 %2373, %v1615_v18  }
 0x29e   : > { %1635 = vperm.xlu1 %2373, %v1617_v19  }
 0x2d8   : > { %v652_v20 = vpop.permute.xlu0 %651  ;;  %v650_v21 = vpop.permute.xlu1 %649 }
 0x2d9   : > { %v656_v22 = vsel %vm655_vm7, %v650_v21, %v652_v20 }
 0x2da   : > { %v664_v27 = vsel %vm662_vm8, %v656_v22, 0 }
 0x2dc   : > { %v849_v23 = vpop.permute.xlu0 %848  ;;  %v654_v24 = vpop.permute.xlu1 %653 }
 0x2dd   : > { %v657_v25 = vsel %vm655_vm7, %v652_v20, %v654_v24  ;;  %v670_v26 = vsel %vm662_vm8, %v654_v24, 0  ;;  %v1275_v24 = vld [vmem:[#allocation9 + $0x18] sm:$0xf] }
 0x2de   : > { %2090 = vmatprep.subr.msk.bf16.mxu0 %vm662_vm8, %v657_v25  ;;  %2169 = vmatpush3.bf16.msra.mxu1 %v670_v26 }
 0x2df   : > { %673 = vmatpush1.bf16.msra.mxu0 %v664_v27  ;;  %2174 = vmatprep.subr.bf16.mxu1 %v2710_v6 }
 0x2e0   : > { %v853_v29 = vpop.permute.xlu0 %852  ;;  %2093 = vmatprep.subr.msk.bf16.mxu0 %vm662_vm8, %v2088_v11  ;;  %v851_v30 = vpop.permute.xlu1 %850 }
 0x2e1   : > { %2171 = vmatmul.mubr.msk.bf16.vlgmr.msra.gmra.mrb[4].mxu1 %vm658_vm9, %v640_v28  ;;  %v856_v33 = vsel %vm854_vm10, %v851_v30, %v853_v29  ;;  %v855_v37 = vsel %vm854_vm10, %v849_v23, %v851_v30  ;;  %v867_v40 = vsel %vm662_vm8, %v853_v29, 0 }
 0x2e2   : > { %2091 = vmatmul.mubr.msk.bf16.vlgmr.msra.gmra.mrb[4].mxu0 %vm658_vm9, %v640_v28  ;;  %2175 = vmatpush3.bf16.msra.mxu1 %v763_v31  ;;  %v861_v42 = vsel %vm662_vm8, %v855_v37, 0  ;;  %v1382_v31 = vld [vmem:[#allocation9 + $0x1c] sm:$0xf] }
 0x2e3   : > { %766 = vmatpush1.bf16.msra.mxu0 %v757_v32  ;;  %2176 = vmatprep.mubr.msk.bf16.mxu1 %vm2712_vm0, %v2710_v6 }
 0x2e4   : > { %v958_v34 = vpop.permute.xlu0 %957  ;;  %v956_v35 = vpop.permute.xlu1 %955  ;;  %2096 = vmatprep.subr.msk.bf16.mxu0 %vm662_vm8, %v856_v33  ;;  %2180 = vmatprep.subr.bf16.mxu1 %v2710_v6 }
 0x2e5   : > { %797 = vmatprep.mubr.bf16.mxu0 %v2711_v10  ;;  %v962_v47 = vsel %vm961_vm11, %v956_v35, %v958_v34  ;;  %v1489_v35 = vld [vmem:[#allocation9 + $0x20] sm:$0xf] }
 0x2e6   : > { %v968_v52 = vsel %vm662_vm8, %v962_v47, 0 }
 0x2e8   : > { %v1063_v38 = vpop.permute.xlu0 %1062  ;;  %v960_v39 = vpop.permute.xlu1 %959 }
 0x2e9   : > { %v963_v41 = vsel %vm961_vm11, %v958_v34, %v960_v39  ;;  %2177 = vmatmul.mubr.msk.bf16.vlgmr.msra.gmra.mrb[8].mxu1 %vm658_vm9, %v638_v36  ;;  %v974_v50 = vsel %vm662_vm8, %v960_v39, 0 }
 0x2ea   : > { %2181 = vmatpush3.bf16.msra.mxu1 %v867_v40  ;;  %2094 = vmatmul.mubr.msk.bf16.vlgmr.msra.gmra.mrb[8].mxu0 %vm658_vm9, %v638_v36  ;;  %v3227_v36 = vld [vmem:[#allocation11] sm:$0xff]  }
 0x2eb   : > { %870 = vmatpush1.bf16.msra.mxu0 %v861_v42  ;;  %2182 = vmatprep.mubr.msk.bf16.mxu1 %vm2712_vm0, %v2710_v6 }
 0x2ec   : > { %2099 = vmatprep.subr.msk.bf16.mxu0 %vm662_vm8, %v963_v41  ;;  %v1067_v43 = vpop.permute.xlu0 %1066  ;;  %v1065_v44 = vpop.permute.xlu1 %1064  ;;  %2186 = vmatprep.subr.bf16.mxu1 %v2710_v6 }
 0x2ed   : > { %901 = vmatprep.mubr.bf16.mxu0 %v2711_v10  ;;  %v1070_v54 = vsel %vm1068_vm12, %v1065_v44, %v1067_v43  ;;  %v1069_v57 = vsel %vm1068_vm12, %v1063_v38, %v1065_v44  ;;  %v1081_v59 = vsel %vm662_vm8, %v1067_v43, 0 }
 0x2ee   : > { %v1075_v60 = vsel %vm662_vm8, %v1069_v57, 0 }
 0x2f0   : > { %v1170_v48 = vpop.permute.xlu1 %1169  ;;  %v1172_v53 = vpop.permute.xlu0 %1171 }
 0x2f1   : > { %2183 = vmatmul.mubr.msk.bf16.vlgmr.msra.gmra.mrb[12].mxu1 %vm658_vm9, %v847_v46  ;;  %v1176_v4 = vsel %vm1175_vm13, %v1170_v48, %v1172_v53 }
 0x2f2   : > { %2187 = vmatpush3.bf16.msra.mxu1 %v974_v50  ;;  %2097 = vmatmul.mubr.msk.bf16.vlgmr.msra.gmra.mrb[12].mxu0 %vm658_vm9, %v847_v46  ;;  %v1182_v11 = vsel %vm662_vm8, %v1176_v4, 0 }
 0x2f3   : > { %977 = vmatpush1.bf16.msra.mxu0 %v968_v52  ;;  %2188 = vmatprep.mubr.msk.bf16.mxu1 %vm2712_vm0, %v2710_v6 }
 0x2f4   : > { %2102 = vmatprep.subr.msk.bf16.mxu0 %vm662_vm8, %v1070_v54  ;;  %2192 = vmatprep.subr.bf16.mxu1 %v2710_v6  ;;  %v1174_v55 = vpop.permute.xlu1 %1173  ;;  %v1277_v58 = vpop.permute.xlu0 %1276 }
 0x2f5   : > { %1008 = vmatprep.mubr.bf16.mxu0 %v2711_v10  ;;  %v1177_v61 = vsel %vm1175_vm13, %v1172_v53, %v1174_v55  ;;  %v1188_v5 = vsel %vm662_vm8, %v1174_v55, 0 }
 0x2f8   : > { %v1279_v62 = vpop.permute.xlu1 %1278  ;;  %v1281_v63 = vpop.permute.xlu0 %1280 }
 0x2f9   : > { %2189 = vmatmul.mubr.msk.bf16.vlgmr.msra.gmra.mrb[16].mxu1 %vm658_vm9, %v954_v56  ;;  %v1284_v15 = vsel %vm1282_vm14, %v1279_v62, %v1281_v63  ;;  %v1283_v18 = vsel %vm1282_vm14, %v1277_v58, %v1279_v62  ;;  %v1295_v20 = vsel %vm662_vm8, %v1281_v63, 0 }
 0x2fa   : > { %2193 = vmatpush3.bf16.msra.mxu1 %v1081_v59  ;;  %2100 = vmatmul.mubr.msk.bf16.vlgmr.msra.gmra.mrb[16].mxu0 %vm658_vm9, %v954_v56  ;;  %v1289_v21 = vsel %vm662_vm8, %v1283_v18, 0 }
 0x2fb   : > { %1084 = vmatpush1.bf16.msra.mxu0 %v1075_v60  ;;  %2194 = vmatprep.mubr.msk.bf16.mxu1 %vm2712_vm0, %v2710_v6 }
 0x2fc   : > { %2105 = vmatprep.subr.msk.bf16.mxu0 %vm662_vm8, %v1177_v61  ;;  %2198 = vmatprep.subr.bf16.mxu1 %v2710_v6  ;;  %v1384_v12 = vpop.permute.xlu1 %1383  ;;  %v1386_v16 = vpop.permute.xlu0 %1385 }
 0x2fd   : > { %1115 = vmatprep.mubr.bf16.mxu0 %v2711_v10  ;;  %v1390_v25 = vsel %vm1389_vm15, %v1384_v12, %v1386_v16 }
 0x2fe   : > { %v1396_v29 = vsel %vm662_vm8, %v1390_v25, 0 }
 0x300   : > { %v1388_v19 = vpop.permute.xlu1 %1387  ;;  %v1491_v22 = vpop.permute.xlu0 %1490 }
 0x301   : > { %2195 = vmatmul.mubr.msk.bf16.vlgmr.msra.gmra.mrb[20].mxu1 %vm658_vm9, %v1061_v0  ;;  %v1391_v23 = vsel %vm1389_vm15, %v1386_v16, %v1388_v19  ;;  %v1402_v28 = vsel %vm662_vm8, %v1388_v19, 0 }
 0x302   : > { %2199 = vmatpush3.bf16.msra.mxu1 %v1188_v5  ;;  %2103 = vmatmul.mubr.msk.bf16.vlgmr.msra.gmra.mrb[20].mxu0 %vm658_vm9, %v1061_v0 }
 0x303   : > { %1191 = vmatpush1.bf16.msra.mxu0 %v1182_v11  ;;  %2200 = vmatprep.mubr.msk.bf16.mxu1 %vm2712_vm0, %v2710_v6 }
 0x304   : > { %2108 = vmatprep.subr.msk.bf16.mxu0 %vm662_vm8, %v1284_v15  ;;  %2204 = vmatprep.subr.bf16.mxu1 %v2710_v6  ;;  %v1495_v26 = vpop.permute.xlu0 %1494  ;;  %v1493_v27 = vpop.permute.xlu1 %1492 }
 0x305   : > { %1222 = vmatprep.mubr.bf16.mxu0 %v2711_v10  ;;  %v1498_v30 = vsel %vm1496_vm1, %v1493_v27, %v1495_v26  ;;  %v1497_v32 = vsel %vm1496_vm1, %v1491_v22, %v1493_v27  ;;  %v1509_v33 = vsel %vm662_vm8, %v1495_v26, 0 }
 0x306   : > { %v1503_v34 = vsel %vm662_vm8, %v1497_v32, 0 }
 0x309   : > { %2201 = vmatmul.mubr.msk.bf16.vlgmr.msra.gmra.mrb[24].mxu1 %vm658_vm9, %v1168_v17 }
 0x30a   : > { %2205 = vmatpush3.bf16.msra.mxu1 %v1295_v20  ;;  %2106 = vmatmul.mubr.msk.bf16.vlgmr.msra.gmra.mrb[24].mxu0 %vm658_vm9, %v1168_v17 }
 0x30b   : > { %1298 = vmatpush1.bf16.msra.mxu0 %v1289_v21  ;;  %2206 = vmatprep.mubr.msk.bf16.mxu1 %vm2712_vm0, %v2710_v6 }
 0x30c   : > { %2111 = vmatprep.subr.msk.bf16.mxu0 %vm662_vm8, %v1391_v23  ;;  %2210 = vmatprep.subr.bf16.mxu1 %v2710_v6 }
 0x30d   : > { %1329 = vmatprep.mubr.bf16.mxu0 %v2711_v10 }
 0x311   : > { %2207 = vmatmul.mubr.msk.bf16.vlgmr.msra.gmra.mrb[28].mxu1 %vm658_vm9, %v1275_v24 }
 0x312   : > { %2211 = vmatpush3.bf16.msra.mxu1 %v1402_v28  ;;  %2109 = vmatmul.mubr.msk.bf16.vlgmr.msra.gmra.mrb[28].mxu0 %vm658_vm9, %v1275_v24 }
 0x313   : > { %1405 = vmatpush1.bf16.msra.mxu0 %v1396_v29  ;;  %2212 = vmatprep.mubr.msk.bf16.mxu1 %vm2712_vm0, %v2710_v6 }
 0x314   : > { %2114 = vmatprep.subr.msk.bf16.mxu0 %vm662_vm8, %v1498_v30  ;;  %2216 = vmatprep.subr.bf16.mxu1 %v2710_v6 }
 0x315   : > { %1436 = vmatprep.mubr.bf16.mxu0 %v2711_v10 }
 0x319   : > { %2213 = vmatmul.mubr.msk.bf16.vlgmr.msra.gmra.mrb[32].mxu1 %vm658_vm9, %v1382_v31 }
 0x31a   : > { %2217 = vmatpush3.bf16.msra.mxu1 %v1509_v33  ;;  %2112 = vmatmul.mubr.msk.bf16.vlgmr.msra.gmra.mrb[32].mxu0 %vm658_vm9, %v1382_v31 }
 0x31b   : > { %1512 = vmatpush1.bf16.msra.mxu0 %v1503_v34  ;;  %2218 = vmatprep.mubr.msk.bf16.mxu1 %vm2712_vm0, %v2710_v6  ;;  %vm1894_vm0 = vcmask 551936  }
 0x31c   : > { %1543 = vmatprep.mubr.bf16.mxu0 %v2711_v10 }
 0x321   : > { %2219 = vmatmul.mubr.msk.bf16.vlgmr.msra.gmra.mrb[36].mxu1 %vm658_vm9, %v1489_v35 }
 0x322   : > { %2115 = vmatmul.mubr.msk.bf16.vlgmr.msra.gmra.mrb[36].mxu0 %vm658_vm9, %v1489_v35  ;;  %2224 = vmatprep.mubr.msk.bf16.mxu1 %vm658_vm9, %v3227_v36 }
 0x323   : > { %1695 = vmatprep.mubr.bf16.mxu0 %v2711_v10 }
 0x3b4   : > { %v747_v37 = vpop.f32.mrb[4].mxu1 }
 0x3b5   : > { %v706_v38 = vpop.f32.mrb[4].mxu0  ;;  %v2172_v39 = vpop.f32.mrb[5].mxu1 }
 0x3b6   : > { %v708_v40 = vpop.f32.mrb[5].mxu0  ;;  %v750_v41 = vpop.f32.mrb[6].mxu1 }
 0x3b7   : > { %v710_v6 = vpop.f32.mrb[6].mxu0  ;;  %v2173_v42 = vpop.f32.mrb[7].mxu1 }
 0x3b8   : > { %v711_v43 = vpop.f32.mrb[7].mxu0 }
 0x3bc   : > { %v840_v44 = vpop.f32.mrb[8].mxu1 }
 0x3bd   : > { %v799_v46 = vpop.f32.mrb[8].mxu0  ;;  %v841_v47 = vadd.f32 %v840_v44, %v747_v37  ;;  %v2178_v48 = vpop.f32.mrb[9].mxu1 }
 0x3be   : > { %v800_v50 = vadd.f32 %v799_v46, %v706_v38  ;;  %v801_v52 = vpop.f32.mrb[9].mxu0  ;;  %v843_v53 = vpop.f32.mrb[10].mxu1 }
 0x3bf   : > { %v802_v54 = vadd.f32 %v801_v52, %v708_v40  ;;  %v803_v55 = vpop.f32.mrb[10].mxu0  ;;  %v2179_v56 = vpop.f32.mrb[11].mxu1 }
 0x3c0   : > { %v804_v57 = vpop.f32.mrb[11].mxu0 }
 0x3c4   : > { %v944_v58 = vpop.f32.mrb[12].mxu1 }
 0x3c5   : > { %v952_v59 = vadd.f32 %v944_v58, %v841_v47  ;;  %v903_v60 = vpop.f32.mrb[12].mxu0  ;;  %v2184_v61 = vpop.f32.mrb[13].mxu1 }
 0x3c6   : > { %v950_v62 = vadd.f32 %v903_v60, %v800_v50  ;;  %v905_v63 = vpop.f32.mrb[13].mxu0  ;;  %v947_v0 = vpop.f32.mrb[14].mxu1 }
 0x3c7   : > { %v951_v4 = vadd.f32 %v905_v63, %v802_v54  ;;  %v907_v5 = vpop.f32.mrb[14].mxu0  ;;  %v2185_v11 = vpop.f32.mrb[15].mxu1 }
 0x3c8   : > { %v908_v12 = vpop.f32.mrb[15].mxu0 }
 0x3cc   : > { %v1051_v15 = vpop.f32.mrb[16].mxu1 }
 0x3cd   : > { %v1059_v16 = vadd.f32 %v1051_v15, %v952_v59  ;;  %v1010_v17 = vpop.f32.mrb[16].mxu0  ;;  %v2190_v18 = vpop.f32.mrb[17].mxu1 }
 0x3ce   : > { %v1057_v19 = vadd.f32 %v1010_v17, %v950_v62  ;;  %v1012_v20 = vpop.f32.mrb[17].mxu0  ;;  %v1054_v21 = vpop.f32.mrb[18].mxu1 }
 0x3cf   : > { %v1058_v22 = vadd.f32 %v1012_v20, %v951_v4  ;;  %v1014_v23 = vpop.f32.mrb[18].mxu0  ;;  %v2191_v24 = vpop.f32.mrb[19].mxu1 }
 0x3d0   : > { %v1015_v25 = vpop.f32.mrb[19].mxu0 }
 0x3d4   : > { %v1158_v26 = vpop.f32.mrb[20].mxu1 }
 0x3d5   : > { %v1166_v27 = vadd.f32 %v1158_v26, %v1059_v16  ;;  %v1117_v28 = vpop.f32.mrb[20].mxu0  ;;  %v2196_v29 = vpop.f32.mrb[21].mxu1 }
 0x3d6   : > { %v1164_v30 = vadd.f32 %v1117_v28, %v1057_v19  ;;  %v1119_v31 = vpop.f32.mrb[21].mxu0  ;;  %v1161_v32 = vpop.f32.mrb[22].mxu1 }
 0x3d7   : > { %v1165_v33 = vadd.f32 %v1119_v31, %v1058_v22  ;;  %v1121_v34 = vpop.f32.mrb[22].mxu0  ;;  %v2197_v35 = vpop.f32.mrb[23].mxu1 }
 0x3d8   : > { %v1122_v37 = vpop.f32.mrb[23].mxu0  ;;  %v1599_v19 = vpop.permute.xlu1 %1598 }
 0x3dc   : > { %v1265_v38 = vpop.f32.mrb[24].mxu1 }
 0x3dd   : > { %v1273_v39 = vadd.f32 %v1265_v38, %v1166_v27  ;;  %v1224_v40 = vpop.f32.mrb[24].mxu0  ;;  %v2202_v41 = vpop.f32.mrb[25].mxu1 }
 0x3de   : > { %v1271_v6 = vadd.f32 %v1224_v40, %v1164_v30  ;;  %v1226_v42 = vpop.f32.mrb[25].mxu0  ;;  %v1268_v43 = vpop.f32.mrb[26].mxu1 }
 0x3df   : > { %v1272_v44 = vadd.f32 %v1226_v42, %v1165_v33  ;;  %v1228_v46 = vpop.f32.mrb[26].mxu0  ;;  %v2203_v47 = vpop.f32.mrb[27].mxu1 }
 0x3e0   : > { %v1229_v48 = vpop.f32.mrb[27].mxu0  ;;  %v1621_v43 = vpop.permute.xlu0 %1620  ;;  %v1773_v46 = vunpack.c.l.bf16 %v3105_v13  ;;  %v1767_v47 = vunpack.c.l.bf16 %v3083_v3 }
 0x3e4   : > { %v1372_v50 = vpop.f32.mrb[28].mxu1  ;;  %v1631_v48 = vpop.permute.xlu0 %1630 }
 0x3e5   : > { %v1380_v52 = vadd.f32 %v1372_v50, %v1273_v39  ;;  %v1331_v53 = vpop.f32.mrb[28].mxu0  ;;  %v2208_v54 = vpop.f32.mrb[29].mxu1 }
 0x3e6   : > { %v1378_v55 = vadd.f32 %v1331_v53, %v1271_v6  ;;  %v1333_v56 = vpop.f32.mrb[29].mxu0  ;;  %v1375_v57 = vpop.f32.mrb[30].mxu1  ;;  %v2384_v6 = vld [vmem:[#allocation11 + $0x8] sm:$0xff]  }
 0x3e7   : > { %v1379_v58 = vadd.f32 %v1333_v56, %v1272_v44  ;;  %v1335_v59 = vpop.f32.mrb[30].mxu0  ;;  %v2209_v60 = vpop.f32.mrb[31].mxu1 }
 0x3e8   : > { %v1336_v61 = vpop.f32.mrb[31].mxu0  ;;  %v1626_v44 = vpop.permute.xlu1 %1625  ;;  %v1766_v59 = vunpack.c.h.bf16 %v3077_v1 }
 0x3ec   : > { %v1479_v62 = vpop.f32.mrb[32].mxu1 }
 0x3ed   : > { %v1487_v63 = vadd.f32 %v1479_v62, %v1380_v52  ;;  %v1438_v0 = vpop.f32.mrb[32].mxu0  ;;  %v2214_v4 = vpop.f32.mrb[33].mxu1 }
 0x3ee   : > { %v1485_v5 = vadd.f32 %v1438_v0, %v1378_v55  ;;  %v1440_v11 = vpop.f32.mrb[33].mxu0  ;;  %v1482_v12 = vpop.f32.mrb[34].mxu1  ;;  %v1765_v55 = vunpack.c.l.bf16 %v3077_v1 }
 0x3ef   : > { %v1486_v15 = vadd.f32 %v1440_v11, %v1379_v58  ;;  %v1442_v16 = vpop.f32.mrb[34].mxu0  ;;  %v2215_v17 = vpop.f32.mrb[35].mxu1 }
 0x3f0   : > { %v1443_v18 = vpop.f32.mrb[35].mxu0  ;;  %v3242_v52 = vpop.permute.xlu1 %1635 }
 0x3f4   : > { %v1586_v20 = vpop.f32.mrb[36].mxu1 }
 0x3f5   : > { %v1594_v21 = vadd.f32 %v1586_v20, %v1487_v63  ;;  %v1545_v22 = vpop.f32.mrb[36].mxu0  ;;  %v2220_v23 = vpop.f32.mrb[37].mxu1  ;;  %v1768_v63 = vunpack.c.l.bf16 %v3080_v2 }
 0x3f6   : > { %v1592_v24 = vadd.f32 %v1545_v22, %v1485_v5  ;;  %v1547_v25 = vpop.f32.mrb[37].mxu0  ;;  %v1589_v26 = vpop.f32.mrb[38].mxu1 }
 0x3f7   : > { %v1603_v27 = vadd.f32 %v1599_v19, %v1594_v21  ;;  %v1593_v28 = vadd.f32 %v1547_v25, %v1486_v15  ;;  %v1549_v29 = vpop.f32.mrb[38].mxu0  ;;  %v2221_v30 = vpop.f32.mrb[39].mxu1 }
 0x3f8   : > { %v1601_v31 = vadd.f32 %v1599_v19, %v1592_v24  ;;  %v1550_v32 = vpop.f32.mrb[39].mxu0 }
 0x3f9   : > { %v1606_v33 = vmax.f32 %v1603_v27, 0.0  ;;  %v1602_v34 = vadd.f32 %v1599_v19, %v1593_v28  ;;  %v1771_v28 = vunpack.c.l.bf16 %v3094_v8 }
 0x3fa   : > { %v1604_v35 = vmax.f32 %v1601_v31, 0.0 }
 0x3fb   : > { %v1609_v37 = vpack.c.bf16 %v1606_v33, %v1606_v33  ;;  %v1605_v38 = vmax.f32 %v1602_v34, 0.0 }
 0x3fc   : > { %v1607_v39 = vpack.c.bf16 %v1604_v35, %v1604_v35 }
 0x3fd   : > { %v1608_v40 = vpack.c.bf16 %v1605_v38, %v1605_v38  ;;  %2228 = vmatprep.subr.msk.bf16.mxu1 %vm662_vm8, %v1609_v37  ;;  %v1661_v41 = vsel %vm662_vm8, %v1609_v37, 0  ;;  %v1772_v37 = vunpack.c.h.bf16 %v3094_v8 }
 0x3fe   : > { %2223 = vmatpush3.bf16.msra.mxu1 %v1661_v41  ;;  %v1655_v42 = vsel %vm662_vm8, %v1607_v39, 0 }
 0x3ff   : > { %2119 = vmatprep.subr.msk.bf16.mxu0 %vm662_vm8, %v1608_v40 }
 0x400   : > { %1664 = vmatpush1.bf16.msra.mxu0 %v1655_v42 }
 0x401   : > { %2225 = vmatmul.mubr.msk.bf16.vlgmr.msra.gmra.mrb[40].mxu1 %vm658_vm9, %v2384_v6 }
 0x403   : > { %2120 = vmatmul.mubr.msk.bf16.vlgmr.msra.gmra.mrb[40].mxu0 %vm658_vm9, %v3227_v36  ;;  %v1776_v36 = vunpack.c.l.bf16 %v3108_v14  ;;  %v1769_v14 = vunpack.c.h.bf16 %v3080_v2 }
 0x404   : > { %1705 = vmatprep.mubr.bf16.mxu0 %v2711_v10  ;;  %v1770_v10 = vunpack.c.l.bf16 %v3091_v7 }
 0x40b   : > { %2121 = vmatmul.mubr.msk.bf16.gmra.mrb[44].mxu0 %vm658_vm9, %v2384_v6  ;;  %v1774_v6 = vunpack.c.l.bf16 %v3097_v9 }
 0x4d4   : > { %v2226_v50 = vpop.f32.mrb[40].mxu1 }
 0x4d5   : > { %v1759_v53 = vadd.f32 %v2226_v50, %v1631_v48  ;;  %v1750_v54 = vpop.f32.mrb[41].mxu1 }
 0x4d6   : > { %v1751_v56 = vadd.f32 %v1750_v54, %v1621_v43  ;;  %v1697_v57 = vpop.f32.mrb[40].mxu0  ;;  %v2227_v58 = vpop.f32.mrb[42].mxu1 }
 0x4d7   : > { %v1785_v13 = vadd.f32 %v1773_v46, %v1759_v53  ;;  %v1698_v60 = vadd.f32 %v1697_v57, %v1621_v43  ;;  %v1762_v3 = vadd.f32 %v2227_v58, %v3242_v52  ;;  %v1699_v61 = vpop.f32.mrb[41].mxu0  ;;  %v1753_v62 = vpop.f32.mrb[43].mxu1 }
 0x4d8   : > { %v1779_v0 = vadd.f32 %v1767_v47, %v1751_v56  ;;  %v1700_v4 = vadd.f32 %v1699_v61, %v1621_v43  ;;  %v1754_v5 = vadd.f32 %v1753_v62, %v1626_v44  ;;  %v1701_v11 = vpop.f32.mrb[42].mxu0  ;;  %v1775_v47 = vunpack.c.h.bf16 %v3097_v9 }
 0x4d9   : > { %v1777_v7 = vadd.f32 %v1765_v55, %v1698_v60  ;;  %v1788_v12 = vadd.f32 %v1776_v36, %v1762_v3  ;;  %v1702_v15 = vadd.f32 %v1701_v11, %v1626_v44  ;;  %v1703_v16 = vpop.f32.mrb[43].mxu0  ;;  %v1797_v19 = vmax.f32 %v1785_v13, 0.0 }
 0x4da   : > { %v1778_v17 = vadd.f32 %v1766_v59, %v1700_v4  ;;  %v1782_v1 = vadd.f32 %v1770_v10, %v1754_v5  ;;  %v1704_v18 = vadd.f32 %v1703_v16, %v1626_v44  ;;  %v1791_v22 = vmax.f32 %v1779_v0, 0.0 }
 0x4db   : > { %v1800_v20 = vmax.f32 %v1788_v12, 0.0  ;;  %v1780_v21 = vadd.f32 %v1768_v63, %v1702_v15  ;;  %v1789_v25 = vmax.f32 %v1777_v7, 0.0 }
 0x4dc   : > { %v1794_v23 = vmax.f32 %v1782_v1, 0.0  ;;  %v1781_v24 = vadd.f32 %v1769_v14, %v1704_v18  ;;  %v1790_v2 = vmax.f32 %v1778_v17, 0.0 }
 0x4dd   : > { %v1806_v26 = vpack.c.bf16 %v1800_v20, %v1797_v19  ;;  %v1792_v27 = vmax.f32 %v1780_v21, 0.0 }
 0x4de   : > { %v1803_v29 = vpack.c.bf16 %v1794_v23, %v1791_v22  ;;  %v1793_v30 = vmax.f32 %v1781_v24, 0.0  ;;  %v1707_v31 = vpop.f32.mrb[44].mxu0 }
 0x4df   : > { %v1858_v32 = vmul.bf16 %v1806_v26, %v3125_v49  ;;  %v1801_v33 = vpack.c.bf16 %v1792_v27, %v1789_v25  ;;  %v1708_v34 = vadd.f32 %v1707_v31, %v1631_v48  ;;  %v1709_v35 = vpop.f32.mrb[45].mxu0 }
 0x4e0   : > { %v1855_v38 = vmul.bf16 %v1803_v29, %v3125_v49  ;;  %v1802_v39 = vpack.c.bf16 %v1793_v30, %v1790_v2  ;;  %v1710_v40 = vadd.f32 %v1709_v35, %v1631_v48  ;;  %v1711_v41 = vpop.f32.mrb[46].mxu0 }
 0x4e1   : > { %v2130_v42 = vcombine.low %v1858_v32, %v1858_v32  ;;  %v2132_v43 = vcombine.high %v1858_v32, %v1858_v32  ;;  %v1853_v44 = vmul.bf16 %v1801_v33, %v3123_v45  ;;  %v1713_v46 = vpop.f32.mrb[47].mxu0  ;;  %v1783_v48 = vadd.f32 %v1771_v28, %v1708_v34 }
 0x4e2   : > { %v2126_v50 = vcombine.low %v1855_v38, %v1855_v38  ;;  %v2128_v8 = vcombine.high %v1855_v38, %v1855_v38  ;;  %v1854_v49 = vmul.bf16 %v1802_v39, %v3127_v51  ;;  %v1784_v53 = vadd.f32 %v1772_v37, %v1710_v40 }
 0x4e3   : > { %1899 = vst.msk [vmem:[%s3072_s12 + $0x20] sm:$0xf] %vm1894_vm0, %v2130_v42  ;;  %1901 = vst.msk [vmem:[%s3072_s12 + $0x2c] sm:$0xf] %vm1894_vm0, %v2132_v43  ;;  %v1712_v54 = vadd.f32 %v1711_v41, %v3242_v52  ;;  %v1714_v55 = vadd.f32 %v1713_v46, %v3242_v52  ;;  %v1795_v57 = vmax.f32 %v1783_v48, 0.0 }
 0x4e4   : > { %1895 = vst.msk [vmem:[%s3072_s12 + $0x8] sm:$0xf] %vm1894_vm0, %v2126_v50  ;;  %1897 = vst.msk [vmem:[%s3072_s12 + $0x14] sm:$0xf] %vm1894_vm0, %v2128_v8  ;;  %v2125_v9 = vcombine.low %v1853_v44, %v1854_v49  ;;  %v2127_v36 = vcombine.high %v1853_v44, %v1854_v49  ;;  %v1796_v58 = vmax.f32 %v1784_v53, 0.0 }
 0x4e5   : > { %v1786_v10 = vadd.f32 %v1774_v6, %v1712_v54  ;;  %v1787_v56 = vadd.f32 %v1775_v47, %v1714_v55 }
 0x4e6   : > { %1893 = vst [vmem:[%s3072_s12] sm:$0xff] %v2125_v9  ;;  %1896 = vst [vmem:[%s3072_s12 + $0xc] sm:$0xff] %v2127_v36 }
 0x4e7   : > { %v1798_v59 = vmax.f32 %v1786_v10, 0.0  ;;  %v1799_v13 = vmax.f32 %v1787_v56, 0.0 }
 0x4e9   : > { %v1804_v52 = vpack.c.bf16 %v1798_v59, %v1795_v57  ;;  %v1805_v60 = vpack.c.bf16 %v1799_v13, %v1796_v58 }
 0x4eb   : > { %v1856_v3 = vmul.bf16 %v1804_v52, %v3123_v45  ;;  %v1857_v61 = vmul.bf16 %v1805_v60, %v3127_v51 }
 0x4ed   : > { %v2129_v62 = vcombine.low %v1856_v3, %v1857_v61  ;;  %v2131_v63 = vcombine.high %v1856_v3, %v1857_v61 }
 0x4ef   : > { %1898 = vst [vmem:[%s3072_s12 + $0x18] sm:$0xff] %v2129_v62  ;;  %1900 = vst [vmem:[%s3072_s12 + $0x24] sm:$0xff] %v2131_v63 }
 0x4f0   : > { %2624 = shalt.err (!%p2621_p5)
}
 0x4f1   : > { %s2625_s12 = scalar_lea.hbm %s3278_s15, 768  ;;  %s2629_s2 = scalar_lea.hbm %s3334_s8, 1536 }
 0x4f2   : > { %p2626_p0 = scmp.ne.s32.totalorder %s3278_s15, %s2625_s12  ;;  %p2630_p8 = scmp.lt.u32.totalorder %s3278_s15, %s3334_s8 }
 0x4f3   : > { %p2631_p11 = scmp.lt.u32.totalorder %s2629_s2, %s2625_s12  ;;  %p2633_p13 = scmp.lt.u32.totalorder %s2625_s12, %s3278_s15 }
 0x4f4   : > { %p2627_p6 = pnand %p2626_p0, %p3362_p1 }
 0x4f5   : > { %p2632_p3 = por %p2631_p11, %p2630_p8 }
 0x4f6   : > { %p2628_p10 = pneg %p2627_p6 }
 0x4f7   : > { %p2634_p4 = por %p2633_p13, %p2632_p3 }
 0x4f9   : > { %p2635_p2 = pnand %p2634_p4, %p2628_p10 }
 0x4fb   : > { %2638 = shalt.err (!%p2635_p2)
}
 0x4fc   : > { %s2724_s26 = smov 192   ;;  %s2725_s16 = smov 12  }
 0x4fd   : > { %2263 = dma.vmem_to_hbm [thread:$0]  (%p3362_p1), %s3280_s14, 768, %s3278_s15, %s1903_s11, %s2724_s26, %s2724_s26, %s2725_s16  }
 0x4fe PF: > { %s1931_s24 = sand.u32 1, %s2681_s27   ;;  %p3363_p9 = scmp.ne.s32.totalorder %s3350_s19, 0 }
 0x4ff   : > { %p3364_p7 = scmp.ge.s32.totalorder %s2693_s30, 2  ;;  %s1932_s23 = scalar_lea.sflag [#allocation5], %s1931_s24 }
 0x501   : > { %p2292_p12 = pnand %p3364_p7, %p3363_p9 }
 0x503   : > { %2676 = dma.done.wait (!%p2292_p12), %s1932_s23, 768  }
 0x504   : > { %2678 = vsyncadd (!%p2292_p12), %s1932_s23, 4294966528  ;;  %p25_p5 = scmp.ge.s32.totalorder %s2973_s20, 4   ;;  %s3365_s27 = smov %s2685_s28 }
 0x505   : > { %s3366_s28 = smov %s2689_s29  ;;  %s3367_s29 = smov %s2985_s13 }
 0x506   : > { %s3368_s30 = smov %s2973_s20  ;;  %27 = sbr.rel (!%p25_p5) target bundleno = 12 (0xc), region = 137 }
 0x50d   :  { %1937 = vsyncpa [#allocation4], 1 }
 0x50e   :  { %1939 = vsyncpa [#allocation4 + $0x1], 1 }
 0x50f   :  { %1940 = vsyncpa [#allocation7], 1 }
 0x510   :  { %1941 = vsyncpa [#allocation10], 1 }
 0x511   :  { %1942 = vsyncpa [#allocation13], 1 }
 0x512   :  { %1943 = vsyncpa [#allocation16], 1 }
 0x513   :  { %1944 = vsyncpa [#allocation5], 1 }
 0x514   :  { %1946 = vsyncpa [#allocation5 + $0x1], 1 }

</bundles_post_ra>
